<compile_context>
chip_gen: v6e
topology: v6e:2x2x1
jax: 0.10.0
libtpu: 0.0.40
codegen_flags: <defaults>
</compile_context>

<pallas_src>
import jax
import jax.numpy as jnp
from jax import lax
from jax.experimental import pallas as pl
from jax.experimental.pallas import tpu as pltpu

BN_EPS = 1e-5
LANE = 128


def _round_up(v, m):
    return (v + m - 1) // m * m


def _make_kernel(Cm_p, Cout, L, Wp, inv_cnt):
    # 3x3 tap offsets in the flattened (batch, padded-plane) lane axis;
    # k = 3*dy + dx matches the per-tap weight stacking in the wrapper.
    offsets = [(dy - 1) * Wp + (dx - 1) for dy in range(3) for dx in range(3)]

    def shifted(a, off):
        # out[:, p] = a[:, p + off].  Interior outputs never wrap (their taps
        # stay inside their own zero-ringed image plane); wrapped lanes only
        # land on masked don't-care positions.  Shift goes to the XLU.
        if off == 0:
            return a
        return pltpu.roll(a, shift=(-off) % L, axis=1)

    def kernel(x_ref, w1_ref, b1_ref, g_ref, bt_ref, w2_ref, b2_ref,
               mask_ref, o_ref):
        x = x_ref[...]                                        # (Cin_p, L)
        mask_b = jnp.broadcast_to(mask_ref[...], (Cm_p, L))   # hoisted once

        # ---- conv1: 9-tap accumulate, one small MXU matmul per tap ---------
        mid = jnp.broadcast_to(b1_ref[...], (Cm_p, L))
        for k, off in enumerate(offsets):
            mid = mid + jnp.dot(w1_ref[k], shifted(x, off),
                                preferred_element_type=jnp.float32)

        # ---- BatchNorm2d training-mode batch stats over masked interior ----
        mean = jnp.sum(mid * mask_b, axis=1, keepdims=True) * inv_cnt
        d = (mid - mean) * mask_b
        var = jnp.sum(d * d, axis=1, keepdims=True) * inv_cnt   # biased var
        scale = g_ref[...] * lax.rsqrt(var + BN_EPS)
        shift = bt_ref[...] - mean * scale

        # ---- ReLU; re-mask so conv2 taps read exact zeros outside interior -
        z = jnp.maximum(mid * scale + shift, 0.0) * mask_b      # (Cm_p, L)

        # ---- conv2: 9-tap accumulate ---------------------------------------
        logits = jnp.broadcast_to(b2_ref[...], (Cout, L))
        for k, off in enumerate(offsets):
            logits = logits + jnp.dot(w2_ref[k], shifted(z, off),
                                      preferred_element_type=jnp.float32)

        # ---- softmax over the channel (sublane) axis ------------------------
        logits = logits - jnp.max(logits, axis=0, keepdims=True)
        e = jnp.exp(logits)
        s = jnp.sum(e, axis=0, keepdims=True)
        inv = pl.reciprocal(s, approx=True)
        inv = inv * (2.0 - s * inv)       # one Newton step -> ~f32 accuracy
        o_ref[...] = e * inv

    return kernel


def demonet_forward(x, w1, b1, gamma, beta, w2, b2):
    N, Cin, H, W = x.shape
    Cm = w1.shape[0]
    Cout = w2.shape[0]
    Hp, Wp = H + 2, W + 2
    P = Hp * Wp
    NP = N * P
    L = _round_up(NP, LANE)            # lane width of every activation
    Cin_p = _round_up(Cin, 8)
    Cm_p = _round_up(Cm, 8)
    f32 = jnp.float32

    # --- wrapper-side layout plumbing (pad / transpose / reshape only) ------
    # input: channels padded to a sublane multiple, spatial zero ring added,
    # (batch, padded plane) flattened onto the lane axis, zero lane tail.
    x_p = jnp.pad(x.astype(f32), ((0, 0), (0, Cin_p - Cin), (1, 1), (1, 1)))
    x_l = jnp.pad(jnp.transpose(x_p, (1, 0, 2, 3)).reshape(Cin_p, NP),
                  ((0, 0), (0, L - NP)))                      # (Cin_p, L)

    # interior mask: 1 on real pixels, 0 on padding ring / lane tail.
    plane = jnp.pad(jnp.ones((H, W), f32), ((1, 1), (1, 1))).reshape(P)
    mask = jnp.pad(jnp.tile(plane, N), (0, L - NP)).reshape(1, L)

    # per-tap weight matrices, stacked so index k = 3*dy + dx.
    w1_p = jnp.zeros((Cm_p, Cin_p, 3, 3), f32).at[:Cm, :Cin].set(w1.astype(f32))
    w2_p = jnp.zeros((Cout, Cm_p, 3, 3), f32).at[:, :Cm].set(w2.astype(f32))
    w1t = jnp.transpose(w1_p, (2, 3, 0, 1)).reshape(9, Cm_p, Cin_p)
    w2t = jnp.transpose(w2_p, (2, 3, 0, 1)).reshape(9, Cout, Cm_p)
    b1_c = jnp.zeros((Cm_p, 1), f32).at[:Cm, 0].set(b1.astype(f32))
    g_c = jnp.zeros((Cm_p, 1), f32).at[:Cm, 0].set(gamma.astype(f32))  # pad->scale 0
    bt_c = jnp.zeros((Cm_p, 1), f32).at[:Cm, 0].set(beta.astype(f32))
    b2_c = b2.reshape(Cout, 1).astype(f32)

    kernel = _make_kernel(Cm_p, Cout, L, Wp, 1.0 / float(N * H * W))
    vmem = pl.BlockSpec(memory_space=pltpu.MemorySpace.VMEM)
    out_slab = pl.pallas_call(
        kernel,
        out_shape=jax.ShapeDtypeStruct((Cout, L), f32),
        in_specs=[vmem] * 8,
        out_specs=vmem,
        compiler_params=pltpu.CompilerParams(
            vmem_limit_bytes=32 * 1024 * 1024),
    )(x_l, w1t, b1_c, g_c, bt_c, w2t, b2_c, mask)

    # un-flatten, crop the padding ring -> NCHW.
    out = out_slab[:, :NP].reshape(Cout, N, Hp, Wp)
    return jnp.transpose(out, (1, 0, 2, 3))[:, :, 1:H + 1, 1:W + 1]


def demonet_reference(x, w1, b1, gamma, beta, w2, b2):
    dn = ('NCHW', 'OIHW', 'NCHW')
    y = lax.conv_general_dilated(x, w1, (1, 1), ((1, 1), (1, 1)),
                                 dimension_numbers=dn) + b1[None, :, None, None]
    mean = jnp.mean(y, axis=(0, 2, 3), keepdims=True)
    var = jnp.mean((y - mean) ** 2, axis=(0, 2, 3), keepdims=True)
    y = (y - mean) * lax.rsqrt(var + BN_EPS) * gamma[None, :, None, None] \
        + beta[None, :, None, None]
    z = jnp.maximum(y, 0.0)
    o = lax.conv_general_dilated(z, w2, (1, 1), ((1, 1), (1, 1)),
                                 dimension_numbers=dn) + b2[None, :, None, None]
    return jax.nn.softmax(o, axis=1)


if __name__ == "__main__":
    N, Cin, Cout, H, W, Cm = 2, 4, 8, 16, 16, 10
    ks = jax.random.split(jax.random.PRNGKey(0), 7)
    x = jax.random.normal(ks[0], (N, Cin, H, W), jnp.float32)
    w1 = 0.2 * jax.random.normal(ks[1], (Cm, Cin, 3, 3), jnp.float32)
    b1 = 0.1 * jax.random.normal(ks[2], (Cm,), jnp.float32)
    gamma = 1.0 + 0.1 * jax.random.normal(ks[3], (Cm,), jnp.float32)
    beta = 0.1 * jax.random.normal(ks[4], (Cm,), jnp.float32)
    w2 = 0.2 * jax.random.normal(ks[5], (Cout, Cm, 3, 3), jnp.float32)
    b2 = 0.1 * jax.random.normal(ks[6], (Cout,), jnp.float32)

    out = jax.jit(demonet_forward)(x, w1, b1, gamma, beta, w2, b2)
    out = jax.block_until_ready(out)

    ref = demonet_reference(x, w1, b1, gamma, beta, w2, b2)
    assert out.shape == (N, Cout, H, W)
    assert bool(jnp.allclose(out, ref, atol=1e-3, rtol=1e-3)), \
        float(jnp.max(jnp.abs(out - ref)))
    print("KERNEL_OK")
</pallas_src>

<mosaic_0001>
module attributes {stable_mosaic.version = 11 : i64} {
  func.func @kernel(%arg0: memref<8x768xf32, #tpu.memory_space<vmem>>, %arg1: memref<9x16x8xf32, #tpu.memory_space<vmem>>, %arg2: memref<16x1xf32, #tpu.memory_space<vmem>>, %arg3: memref<16x1xf32, #tpu.memory_space<vmem>>, %arg4: memref<16x1xf32, #tpu.memory_space<vmem>>, %arg5: memref<9x8x16xf32, #tpu.memory_space<vmem>>, %arg6: memref<8x1xf32, #tpu.memory_space<vmem>>, %arg7: memref<1x768xf32, #tpu.memory_space<vmem>>, %arg8: memref<8x768xf32, #tpu.memory_space<vmem>>) attributes {dimension_semantics = [], scalar_prefetch = 0 : i64, scratch_operands = 0 : i64, tpu.core_type = #tpu.core_type<tc>} {
    %c0 = arith.constant 0 : index
    %c0_0 = arith.constant 0 : index
    %0 = vector.load %arg0[%c0, %c0_0] : memref<8x768xf32, #tpu.memory_space<vmem>>, vector<8x768xf32>
    %c0_1 = arith.constant 0 : index
    %c0_2 = arith.constant 0 : index
    %1 = vector.load %arg7[%c0_1, %c0_2] : memref<1x768xf32, #tpu.memory_space<vmem>>, vector<1x768xf32>
    %2 = vector.shape_cast %1 : vector<1x768xf32> to vector<1x768xf32>
    %3 = vector.broadcast %2 : vector<1x768xf32> to vector<16x768xf32>
    %c0_3 = arith.constant 0 : index
    %c0_4 = arith.constant 0 : index
    %4 = vector.load %arg2[%c0_3, %c0_4] : memref<16x1xf32, #tpu.memory_space<vmem>>, vector<16x1xf32>
    %5 = vector.shape_cast %4 : vector<16x1xf32> to vector<16x1xf32>
    %6 = vector.broadcast %5 : vector<16x1xf32> to vector<16x768xf32>
    %c0_5 = arith.constant 0 : index
    %c0_6 = arith.constant 0 : index
    %c0_7 = arith.constant 0 : index
    %7 = vector.load %arg1[%c0_5, %c0_6, %c0_7] : memref<9x16x8xf32, #tpu.memory_space<vmem>>, vector<1x16x8xf32>
    %8 = vector.shape_cast %7 : vector<1x16x8xf32> to vector<16x8xf32>
    %c19_i32 = arith.constant 19 : i32
    %9 = tpu.dynamic_rotate %0 by %c19_i32 dim 1 : vector<8x768xf32>, i32 -> vector<8x768xf32>
    %cst = arith.constant dense<0.000000e+00> : vector<16x768xf32>
    %10 = tpu.matmul %8, %9, %cst {dimension_numbers = #tpu.dot_dimension_numbers<[1], [0], [0], [1], [0, 0, 1, 1], [], []>} : vector<16x8xf32>, vector<8x768xf32>, vector<16x768xf32> -> vector<16x768xf32>
    %11 = arith.addf %6, %10 : vector<16x768xf32>
    %c1 = arith.constant 1 : index
    %c0_8 = arith.constant 0 : index
    %c0_9 = arith.constant 0 : index
    %12 = vector.load %arg1[%c1, %c0_8, %c0_9] : memref<9x16x8xf32, #tpu.memory_space<vmem>>, vector<1x16x8xf32>
    %13 = vector.shape_cast %12 : vector<1x16x8xf32> to vector<16x8xf32>
    %c18_i32 = arith.constant 18 : i32
    %14 = tpu.dynamic_rotate %0 by %c18_i32 dim 1 : vector<8x768xf32>, i32 -> vector<8x768xf32>
    %cst_10 = arith.constant dense<0.000000e+00> : vector<16x768xf32>
    %15 = tpu.matmul %13, %14, %cst_10 {dimension_numbers = #tpu.dot_dimension_numbers<[1], [0], [0], [1], [0, 0, 1, 1], [], []>} : vector<16x8xf32>, vector<8x768xf32>, vector<16x768xf32> -> vector<16x768xf32>
    %16 = arith.addf %11, %15 : vector<16x768xf32>
    %c2 = arith.constant 2 : index
    %c0_11 = arith.constant 0 : index
    %c0_12 = arith.constant 0 : index
    %17 = vector.load %arg1[%c2, %c0_11, %c0_12] : memref<9x16x8xf32, #tpu.memory_space<vmem>>, vector<1x16x8xf32>
    %18 = vector.shape_cast %17 : vector<1x16x8xf32> to vector<16x8xf32>
    %c17_i32 = arith.constant 17 : i32
    %19 = tpu.dynamic_rotate %0 by %c17_i32 dim 1 : vector<8x768xf32>, i32 -> vector<8x768xf32>
    %cst_13 = arith.constant dense<0.000000e+00> : vector<16x768xf32>
    %20 = tpu.matmul %18, %19, %cst_13 {dimension_numbers = #tpu.dot_dimension_numbers<[1], [0], [0], [1], [0, 0, 1, 1], [], []>} : vector<16x8xf32>, vector<8x768xf32>, vector<16x768xf32> -> vector<16x768xf32>
    %21 = arith.addf %16, %20 : vector<16x768xf32>
    %c3 = arith.constant 3 : index
    %c0_14 = arith.constant 0 : index
    %c0_15 = arith.constant 0 : index
    %22 = vector.load %arg1[%c3, %c0_14, %c0_15] : memref<9x16x8xf32, #tpu.memory_space<vmem>>, vector<1x16x8xf32>
    %23 = vector.shape_cast %22 : vector<1x16x8xf32> to vector<16x8xf32>
    %c1_i32 = arith.constant 1 : i32
    %24 = tpu.dynamic_rotate %0 by %c1_i32 dim 1 : vector<8x768xf32>, i32 -> vector<8x768xf32>
    %cst_16 = arith.constant dense<0.000000e+00> : vector<16x768xf32>
    %25 = tpu.matmul %23, %24, %cst_16 {dimension_numbers = #tpu.dot_dimension_numbers<[1], [0], [0], [1], [0, 0, 1, 1], [], []>} : vector<16x8xf32>, vector<8x768xf32>, vector<16x768xf32> -> vector<16x768xf32>
    %26 = arith.addf %21, %25 : vector<16x768xf32>
    %c4 = arith.constant 4 : index
    %c0_17 = arith.constant 0 : index
    %c0_18 = arith.constant 0 : index
    %27 = vector.load %arg1[%c4, %c0_17, %c0_18] : memref<9x16x8xf32, #tpu.memory_space<vmem>>, vector<1x16x8xf32>
    %28 = vector.shape_cast %27 : vector<1x16x8xf32> to vector<16x8xf32>
    %cst_19 = arith.constant dense<0.000000e+00> : vector<16x768xf32>
    %29 = tpu.matmul %28, %0, %cst_19 {dimension_numbers = #tpu.dot_dimension_numbers<[1], [0], [0], [1], [0, 0, 1, 1], [], []>} : vector<16x8xf32>, vector<8x768xf32>, vector<16x768xf32> -> vector<16x768xf32>
    %30 = arith.addf %26, %29 : vector<16x768xf32>
    %c5 = arith.constant 5 : index
    %c0_20 = arith.constant 0 : index
    %c0_21 = arith.constant 0 : index
    %31 = vector.load %arg1[%c5, %c0_20, %c0_21] : memref<9x16x8xf32, #tpu.memory_space<vmem>>, vector<1x16x8xf32>
    %32 = vector.shape_cast %31 : vector<1x16x8xf32> to vector<16x8xf32>
    %c767_i32 = arith.constant 767 : i32
    %33 = tpu.dynamic_rotate %0 by %c767_i32 dim 1 : vector<8x768xf32>, i32 -> vector<8x768xf32>
    %cst_22 = arith.constant dense<0.000000e+00> : vector<16x768xf32>
    %34 = tpu.matmul %32, %33, %cst_22 {dimension_numbers = #tpu.dot_dimension_numbers<[1], [0], [0], [1], [0, 0, 1, 1], [], []>} : vector<16x8xf32>, vector<8x768xf32>, vector<16x768xf32> -> vector<16x768xf32>
    %35 = arith.addf %30, %34 : vector<16x768xf32>
    %c6 = arith.constant 6 : index
    %c0_23 = arith.constant 0 : index
    %c0_24 = arith.constant 0 : index
    %36 = vector.load %arg1[%c6, %c0_23, %c0_24] : memref<9x16x8xf32, #tpu.memory_space<vmem>>, vector<1x16x8xf32>
    %37 = vector.shape_cast %36 : vector<1x16x8xf32> to vector<16x8xf32>
    %c751_i32 = arith.constant 751 : i32
    %38 = tpu.dynamic_rotate %0 by %c751_i32 dim 1 : vector<8x768xf32>, i32 -> vector<8x768xf32>
    %cst_25 = arith.constant dense<0.000000e+00> : vector<16x768xf32>
    %39 = tpu.matmul %37, %38, %cst_25 {dimension_numbers = #tpu.dot_dimension_numbers<[1], [0], [0], [1], [0, 0, 1, 1], [], []>} : vector<16x8xf32>, vector<8x768xf32>, vector<16x768xf32> -> vector<16x768xf32>
    %40 = arith.addf %35, %39 : vector<16x768xf32>
    %c7 = arith.constant 7 : index
    %c0_26 = arith.constant 0 : index
    %c0_27 = arith.constant 0 : index
    %41 = vector.load %arg1[%c7, %c0_26, %c0_27] : memref<9x16x8xf32, #tpu.memory_space<vmem>>, vector<1x16x8xf32>
    %42 = vector.shape_cast %41 : vector<1x16x8xf32> to vector<16x8xf32>
    %c750_i32 = arith.constant 750 : i32
    %43 = tpu.dynamic_rotate %0 by %c750_i32 dim 1 : vector<8x768xf32>, i32 -> vector<8x768xf32>
    %cst_28 = arith.constant dense<0.000000e+00> : vector<16x768xf32>
    %44 = tpu.matmul %42, %43, %cst_28 {dimension_numbers = #tpu.dot_dimension_numbers<[1], [0], [0], [1], [0, 0, 1, 1], [], []>} : vector<16x8xf32>, vector<8x768xf32>, vector<16x768xf32> -> vector<16x768xf32>
    %45 = arith.addf %40, %44 : vector<16x768xf32>
    %c8 = arith.constant 8 : index
    %c0_29 = arith.constant 0 : index
    %c0_30 = arith.constant 0 : index
    %46 = vector.load %arg1[%c8, %c0_29, %c0_30] : memref<9x16x8xf32, #tpu.memory_space<vmem>>, vector<1x16x8xf32>
    %47 = vector.shape_cast %46 : vector<1x16x8xf32> to vector<16x8xf32>
    %c749_i32 = arith.constant 749 : i32
    %48 = tpu.dynamic_rotate %0 by %c749_i32 dim 1 : vector<8x768xf32>, i32 -> vector<8x768xf32>
    %cst_31 = arith.constant dense<0.000000e+00> : vector<16x768xf32>
    %49 = tpu.matmul %47, %48, %cst_31 {dimension_numbers = #tpu.dot_dimension_numbers<[1], [0], [0], [1], [0, 0, 1, 1], [], []>} : vector<16x8xf32>, vector<8x768xf32>, vector<16x768xf32> -> vector<16x768xf32>
    %50 = arith.addf %45, %49 : vector<16x768xf32>
    %51 = arith.mulf %50, %3 : vector<16x768xf32>
    %cst_32 = arith.constant dense<0.000000e+00> : vector<16xf32>
    %52 = vector.multi_reduction <add>, %51, %cst_32 [1] : vector<16x768xf32> to vector<16xf32>
    %53 = vector.shape_cast %52 : vector<16xf32> to vector<16x1xf32>
    %cst_33 = arith.constant 0.001953125 : f32
    %54 = vector.broadcast %cst_33 : f32 to vector<16x1xf32>
    %55 = arith.mulf %53, %54 : vector<16x1xf32>
    %56 = vector.broadcast %55 : vector<16x1xf32> to vector<16x768xf32>
    %57 = arith.subf %50, %56 : vector<16x768xf32>
    %58 = arith.mulf %57, %3 : vector<16x768xf32>
    %59 = arith.mulf %58, %58 : vector<16x768xf32>
    %cst_34 = arith.constant dense<0.000000e+00> : vector<16xf32>
    %60 = vector.multi_reduction <add>, %59, %cst_34 [1] : vector<16x768xf32> to vector<16xf32>
    %61 = vector.shape_cast %60 : vector<16xf32> to vector<16x1xf32>
    %cst_35 = arith.constant 0.001953125 : f32
    %62 = vector.broadcast %cst_35 : f32 to vector<16x1xf32>
    %63 = arith.mulf %61, %62 : vector<16x1xf32>
    %c0_36 = arith.constant 0 : index
    %c0_37 = arith.constant 0 : index
    %64 = vector.load %arg3[%c0_36, %c0_37] : memref<16x1xf32, #tpu.memory_space<vmem>>, vector<16x1xf32>
    %cst_38 = arith.constant 9.99999974E-6 : f32
    %65 = vector.broadcast %cst_38 : f32 to vector<16x1xf32>
    %66 = arith.addf %63, %65 : vector<16x1xf32>
    %67 = math.rsqrt %66 : vector<16x1xf32>
    %68 = arith.mulf %64, %67 : vector<16x1xf32>
    %c0_39 = arith.constant 0 : index
    %c0_40 = arith.constant 0 : index
    %69 = vector.load %arg4[%c0_39, %c0_40] : memref<16x1xf32, #tpu.memory_space<vmem>>, vector<16x1xf32>
    %70 = arith.mulf %55, %68 : vector<16x1xf32>
    %71 = arith.subf %69, %70 : vector<16x1xf32>
    %72 = vector.broadcast %68 : vector<16x1xf32> to vector<16x768xf32>
    %73 = arith.mulf %50, %72 : vector<16x768xf32>
    %74 = vector.broadcast %71 : vector<16x1xf32> to vector<16x768xf32>
    %75 = arith.addf %73, %74 : vector<16x768xf32>
    %cst_41 = arith.constant 0.000000e+00 : f32
    %76 = vector.broadcast %cst_41 : f32 to vector<16x768xf32>
    %77 = arith.maximumf %75, %76 : vector<16x768xf32>
    %78 = arith.mulf %77, %3 : vector<16x768xf32>
    %c0_42 = arith.constant 0 : index
    %c0_43 = arith.constant 0 : index
    %79 = vector.load %arg6[%c0_42, %c0_43] : memref<8x1xf32, #tpu.memory_space<vmem>>, vector<8x1xf32>
    %80 = vector.shape_cast %79 : vector<8x1xf32> to vector<8x1xf32>
    %81 = vector.broadcast %80 : vector<8x1xf32> to vector<8x768xf32>
    %c0_44 = arith.constant 0 : index
    %c0_45 = arith.constant 0 : index
    %c0_46 = arith.constant 0 : index
    %82 = vector.load %arg5[%c0_44, %c0_45, %c0_46] : memref<9x8x16xf32, #tpu.memory_space<vmem>>, vector<1x8x16xf32>
    %83 = vector.shape_cast %82 : vector<1x8x16xf32> to vector<8x16xf32>
    %c19_i32_47 = arith.constant 19 : i32
    %84 = tpu.dynamic_rotate %78 by %c19_i32_47 dim 1 : vector<16x768xf32>, i32 -> vector<16x768xf32>
    %cst_48 = arith.constant dense<0.000000e+00> : vector<8x768xf32>
    %85 = tpu.matmul %83, %84, %cst_48 {dimension_numbers = #tpu.dot_dimension_numbers<[1], [0], [0], [1], [0, 0, 1, 1], [], []>} : vector<8x16xf32>, vector<16x768xf32>, vector<8x768xf32> -> vector<8x768xf32>
    %86 = arith.addf %81, %85 : vector<8x768xf32>
    %c1_49 = arith.constant 1 : index
    %c0_50 = arith.constant 0 : index
    %c0_51 = arith.constant 0 : index
    %87 = vector.load %arg5[%c1_49, %c0_50, %c0_51] : memref<9x8x16xf32, #tpu.memory_space<vmem>>, vector<1x8x16xf32>
    %88 = vector.shape_cast %87 : vector<1x8x16xf32> to vector<8x16xf32>
    %c18_i32_52 = arith.constant 18 : i32
    %89 = tpu.dynamic_rotate %78 by %c18_i32_52 dim 1 : vector<16x768xf32>, i32 -> vector<16x768xf32>
    %cst_53 = arith.constant dense<0.000000e+00> : vector<8x768xf32>
    %90 = tpu.matmul %88, %89, %cst_53 {dimension_numbers = #tpu.dot_dimension_numbers<[1], [0], [0], [1], [0, 0, 1, 1], [], []>} : vector<8x16xf32>, vector<16x768xf32>, vector<8x768xf32> -> vector<8x768xf32>
    %91 = arith.addf %86, %90 : vector<8x768xf32>
    %c2_54 = arith.constant 2 : index
    %c0_55 = arith.constant 0 : index
    %c0_56 = arith.constant 0 : index
    %92 = vector.load %arg5[%c2_54, %c0_55, %c0_56] : memref<9x8x16xf32, #tpu.memory_space<vmem>>, vector<1x8x16xf32>
    %93 = vector.shape_cast %92 : vector<1x8x16xf32> to vector<8x16xf32>
    %c17_i32_57 = arith.constant 17 : i32
    %94 = tpu.dynamic_rotate %78 by %c17_i32_57 dim 1 : vector<16x768xf32>, i32 -> vector<16x768xf32>
    %cst_58 = arith.constant dense<0.000000e+00> : vector<8x768xf32>
    %95 = tpu.matmul %93, %94, %cst_58 {dimension_numbers = #tpu.dot_dimension_numbers<[1], [0], [0], [1], [0, 0, 1, 1], [], []>} : vector<8x16xf32>, vector<16x768xf32>, vector<8x768xf32> -> vector<8x768xf32>
    %96 = arith.addf %91, %95 : vector<8x768xf32>
    %c3_59 = arith.constant 3 : index
    %c0_60 = arith.constant 0 : index
    %c0_61 = arith.constant 0 : index
    %97 = vector.load %arg5[%c3_59, %c0_60, %c0_61] : memref<9x8x16xf32, #tpu.memory_space<vmem>>, vector<1x8x16xf32>
    %98 = vector.shape_cast %97 : vector<1x8x16xf32> to vector<8x16xf32>
    %c1_i32_62 = arith.constant 1 : i32
    %99 = tpu.dynamic_rotate %78 by %c1_i32_62 dim 1 : vector<16x768xf32>, i32 -> vector<16x768xf32>
    %cst_63 = arith.constant dense<0.000000e+00> : vector<8x768xf32>
    %100 = tpu.matmul %98, %99, %cst_63 {dimension_numbers = #tpu.dot_dimension_numbers<[1], [0], [0], [1], [0, 0, 1, 1], [], []>} : vector<8x16xf32>, vector<16x768xf32>, vector<8x768xf32> -> vector<8x768xf32>
    %101 = arith.addf %96, %100 : vector<8x768xf32>
    %c4_64 = arith.constant 4 : index
    %c0_65 = arith.constant 0 : index
    %c0_66 = arith.constant 0 : index
    %102 = vector.load %arg5[%c4_64, %c0_65, %c0_66] : memref<9x8x16xf32, #tpu.memory_space<vmem>>, vector<1x8x16xf32>
    %103 = vector.shape_cast %102 : vector<1x8x16xf32> to vector<8x16xf32>
    %cst_67 = arith.constant dense<0.000000e+00> : vector<8x768xf32>
    %104 = tpu.matmul %103, %78, %cst_67 {dimension_numbers = #tpu.dot_dimension_numbers<[1], [0], [0], [1], [0, 0, 1, 1], [], []>} : vector<8x16xf32>, vector<16x768xf32>, vector<8x768xf32> -> vector<8x768xf32>
    %105 = arith.addf %101, %104 : vector<8x768xf32>
    %c5_68 = arith.constant 5 : index
    %c0_69 = arith.constant 0 : index
    %c0_70 = arith.constant 0 : index
    %106 = vector.load %arg5[%c5_68, %c0_69, %c0_70] : memref<9x8x16xf32, #tpu.memory_space<vmem>>, vector<1x8x16xf32>
    %107 = vector.shape_cast %106 : vector<1x8x16xf32> to vector<8x16xf32>
    %c767_i32_71 = arith.constant 767 : i32
    %108 = tpu.dynamic_rotate %78 by %c767_i32_71 dim 1 : vector<16x768xf32>, i32 -> vector<16x768xf32>
    %cst_72 = arith.constant dense<0.000000e+00> : vector<8x768xf32>
    %109 = tpu.matmul %107, %108, %cst_72 {dimension_numbers = #tpu.dot_dimension_numbers<[1], [0], [0], [1], [0, 0, 1, 1], [], []>} : vector<8x16xf32>, vector<16x768xf32>, vector<8x768xf32> -> vector<8x768xf32>
    %110 = arith.addf %105, %109 : vector<8x768xf32>
    %c6_73 = arith.constant 6 : index
    %c0_74 = arith.constant 0 : index
    %c0_75 = arith.constant 0 : index
    %111 = vector.load %arg5[%c6_73, %c0_74, %c0_75] : memref<9x8x16xf32, #tpu.memory_space<vmem>>, vector<1x8x16xf32>
    %112 = vector.shape_cast %111 : vector<1x8x16xf32> to vector<8x16xf32>
    %c751_i32_76 = arith.constant 751 : i32
    %113 = tpu.dynamic_rotate %78 by %c751_i32_76 dim 1 : vector<16x768xf32>, i32 -> vector<16x768xf32>
    %cst_77 = arith.constant dense<0.000000e+00> : vector<8x768xf32>
    %114 = tpu.matmul %112, %113, %cst_77 {dimension_numbers = #tpu.dot_dimension_numbers<[1], [0], [0], [1], [0, 0, 1, 1], [], []>} : vector<8x16xf32>, vector<16x768xf32>, vector<8x768xf32> -> vector<8x768xf32>
    %115 = arith.addf %110, %114 : vector<8x768xf32>
    %c7_78 = arith.constant 7 : index
    %c0_79 = arith.constant 0 : index
    %c0_80 = arith.constant 0 : index
    %116 = vector.load %arg5[%c7_78, %c0_79, %c0_80] : memref<9x8x16xf32, #tpu.memory_space<vmem>>, vector<1x8x16xf32>
    %117 = vector.shape_cast %116 : vector<1x8x16xf32> to vector<8x16xf32>
    %c750_i32_81 = arith.constant 750 : i32
    %118 = tpu.dynamic_rotate %78 by %c750_i32_81 dim 1 : vector<16x768xf32>, i32 -> vector<16x768xf32>
    %cst_82 = arith.constant dense<0.000000e+00> : vector<8x768xf32>
    %119 = tpu.matmul %117, %118, %cst_82 {dimension_numbers = #tpu.dot_dimension_numbers<[1], [0], [0], [1], [0, 0, 1, 1], [], []>} : vector<8x16xf32>, vector<16x768xf32>, vector<8x768xf32> -> vector<8x768xf32>
    %120 = arith.addf %115, %119 : vector<8x768xf32>
    %c8_83 = arith.constant 8 : index
    %c0_84 = arith.constant 0 : index
    %c0_85 = arith.constant 0 : index
    %121 = vector.load %arg5[%c8_83, %c0_84, %c0_85] : memref<9x8x16xf32, #tpu.memory_space<vmem>>, vector<1x8x16xf32>
    %122 = vector.shape_cast %121 : vector<1x8x16xf32> to vector<8x16xf32>
    %c749_i32_86 = arith.constant 749 : i32
    %123 = tpu.dynamic_rotate %78 by %c749_i32_86 dim 1 : vector<16x768xf32>, i32 -> vector<16x768xf32>
    %cst_87 = arith.constant dense<0.000000e+00> : vector<8x768xf32>
    %124 = tpu.matmul %122, %123, %cst_87 {dimension_numbers = #tpu.dot_dimension_numbers<[1], [0], [0], [1], [0, 0, 1, 1], [], []>} : vector<8x16xf32>, vector<16x768xf32>, vector<8x768xf32> -> vector<8x768xf32>
    %125 = arith.addf %120, %124 : vector<8x768xf32>
    %cst_88 = arith.constant dense<0xFF800000> : vector<768xf32>
    %126 = vector.multi_reduction <maximumf>, %125, %cst_88 [0] : vector<8x768xf32> to vector<768xf32>
    %127 = vector.shape_cast %126 : vector<768xf32> to vector<1x768xf32>
    %128 = vector.broadcast %127 : vector<1x768xf32> to vector<8x768xf32>
    %129 = arith.subf %125, %128 : vector<8x768xf32>
    %130 = math.exp %129 : vector<8x768xf32>
    %cst_89 = arith.constant dense<0.000000e+00> : vector<768xf32>
    %131 = vector.multi_reduction <add>, %130, %cst_89 [0] : vector<8x768xf32> to vector<768xf32>
    %132 = vector.shape_cast %131 : vector<768xf32> to vector<1x768xf32>
    %133 = tpu.reciprocal %132 {approx = true} : vector<1x768xf32> -> vector<1x768xf32>
    %134 = arith.mulf %132, %133 : vector<1x768xf32>
    %cst_90 = arith.constant 2.000000e+00 : f32
    %135 = vector.broadcast %cst_90 : f32 to vector<1x768xf32>
    %136 = arith.subf %135, %134 : vector<1x768xf32>
    %137 = arith.mulf %133, %136 : vector<1x768xf32>
    %138 = vector.broadcast %137 : vector<1x768xf32> to vector<8x768xf32>
    %139 = arith.mulf %130, %138 : vector<8x768xf32>
    %c0_91 = arith.constant 0 : index
    %c0_92 = arith.constant 0 : index
    %140 = vector.load %arg8[%c0_91, %c0_92] : memref<8x768xf32, #tpu.memory_space<vmem>>, vector<8x768xf32>
    tpu.vector_store %arg8[%c0_91, %c0_92], %139 {strides = array<i32>} : memref<8x768xf32, #tpu.memory_space<vmem>>, vector<8x768xf32>,
    return
  }
}

</mosaic_0001>

<bundles_post_ra>
// kernel: tile.5
= control target key start
LH: loop header
LB: loop body
LE: loop exit
PB: predicated region body
PF: predicated region fallthrough
CT: control target
= control target key end

     0   :  { %vm9_vm0 = vcmask 15360   ;;  %vm22_vm1 = vcmask 31744   ;;  %s175_s14 = smov 126   ;;  %s176_s15 = smov 108   ;;  %vm3_vm2 = vcmask 146432   ;;  %vm13_vm3 = vcmask 130048   ;;  %s265_s0 = inlined_call_operand.vmem [shape: f32[18,18], index: 0, kind: input, shape index: {}]   ;;  %s266_s1 = inlined_call_operand.vmem [shape: f32[324], index: 1, kind: output, shape index: {}]  }
   0x1   :  { %v139_v0 = vld [vmem:[%s265_s0 + $0x7] sm:$0x1]   ;;  %v143_v3 = vld [vmem:[%s265_s0 + $0x6] sm:$0x1]   ;;  %v141_v4 = vld [vmem:[%s265_s0 + $0xe] sm:$0x1]  }
   0x2   :  { %v140_v1 = vld [vmem:[%s265_s0 + $0x7] sm:$0x1]   ;;  %34 = vrot.lane.b32.xlu1 %v143_v3, %s176_s15  ;;  %v142_v5 = vld [vmem:[%s265_s0 + $0xe] sm:$0x1]   ;;  %v144_v7 = vld [vmem:[%s265_s0 + $0xd] sm:$0x1]  }
   0x3   :  { %v10_v2 = vsel %vm9_vm0, %v140_v1, %v139_v0  ;;  %v23_v6 = vsel %vm22_vm1, %v142_v5, %v141_v4  ;;  %s177_s20 = smov 124   ;;  %s178_s21 = smov 106   ;;  %v145_v8 = vld [vmem:[%s265_s0 + $0x5] sm:$0x1]   ;;  %v146_v9 = vld [vmem:[%s265_s0 + $0xc] sm:$0x1]  }
   0x4   :  { %11 = vrot.lane.b32.xlu0 %v10_v2, %s175_s14  ;;  %s179_s26 = smov 90   ;;  %s180_s27 = smov 88   ;;  %v2_v10 = vld [vmem:[%s265_s0] sm:$0x1]   ;;  %v147_v11 = vld [vmem:[%s265_s0 + $0x4] sm:$0x1]  }
   0x5   :  { %v148_v12 = vld [vmem:[%s265_s0 + $0xb] sm:$0x1]   ;;  %4 = vst.msk [vmem:[#allocation0] sm:$0x1] %vm3_vm2, %v2_v10   ;;  %s181_s5 = smov 72   ;;  %s182_s6 = smov 70  }
   0x6   :  { %40 = vrot.lane.b32.xlu1 %v144_v7, %s178_s21  ;;  %v149_v13 = vld [vmem:[%s265_s0 + $0x3] sm:$0x1]   ;;  %v150_v14 = vld [vmem:[%s265_s0 + $0xa] sm:$0x1]   ;;  %s183_s11 = smov 54   ;;  %s184_s12 = smov 52  }
   0x7   :  { %v151_v15 = vld [vmem:[%s265_s0 + $0x11] sm:$0x1]   ;;  %v152_v16 = vld [vmem:[%s265_s0 + $0x2] sm:$0x1]   ;;  %s185_s17 = smov 50   ;;  %s186_s18 = smov 36  }
   0x8   :  { %24 = vrot.lane.b32.xlu0 %v23_v6, %s177_s20  ;;  %v153_v17 = vld [vmem:[%s265_s0 + $0x9] sm:$0x1]   ;;  %v154_v18 = vld [vmem:[%s265_s0 + $0x10] sm:$0x1]   ;;  %s187_s23 = smov 34   ;;  %s188_s24 = smov 32  }
   0x9   :  { %v155_v19 = vld [vmem:[%s265_s0 + $0x1] sm:$0x1]   ;;  %v156_v20 = vld [vmem:[%s265_s0 + $0x8] sm:$0x1]   ;;  %s189_s29 = smov 18   ;;  %s190_s30 = smov 16  }
   0xa   :  { %53 = vrot.lane.b32.xlu1 %v146_v9, %s180_s27  ;;  %v157_v21 = vld [vmem:[%s265_s0 + $0xf] sm:$0x1]   ;;  %s191_s0 = smov 14   ;;  %vm16_vm4 = vcmask 1048560   ;;  %vm36_vm5 = vcmask 1032032   ;;  %vm26_vm6 = vcmask 113664  }
   0xb   :  { %vm29_vm7 = vcmask 1048544   ;;  %vm42_vm8 = vcmask 1015632   ;;  %vm49_vm9 = vcmask 884432   ;;  %vm55_vm10 = vcmask 868032  }
   0xc   :  { %47 = vrot.lane.b32.xlu0 %v145_v8, %s179_s26  ;;  %vm62_vm11 = vcmask 736832   ;;  %vm68_vm12 = vcmask 720432   ;;  %vm75_vm13 = vcmask 589232   ;;  %vm81_vm14 = vcmask 572832  }
   0xd   :  { %vm88_vm15 = vcmask 556432   ;;  %vm95_vm0 = vcmask 441632   ;;  %vm101_vm1 = vcmask 425232   ;;  %vm108_vm2 = vcmask 408832  }
   0xe   :  { %66 = vrot.lane.b32.xlu1 %v148_v12, %s182_s6 }
  0x10   :  { %60 = vrot.lane.b32.xlu0 %v147_v11, %s181_s5 }
  0x12   :  { %79 = vrot.lane.b32.xlu1 %v150_v14, %s184_s12 }
  0x14   :  { %73 = vrot.lane.b32.xlu0 %v149_v13, %s183_s11 }
  0x16   :  { %93 = vrot.lane.b32.xlu1 %v152_v16, %s186_s18 }
  0x18   :  { %86 = vrot.lane.b32.xlu0 %v151_v15, %s185_s17 }
  0x1a   :  { %106 = vrot.lane.b32.xlu1 %v154_v18, %s188_s24 }
  0x1c   :  { %99 = vrot.lane.b32.xlu0 %v153_v17, %s187_s23 }
  0x1e   :  { %119 = vrot.lane.b32.xlu1 %v156_v20, %s190_s30 }
  0x20   :  { %113 = vrot.lane.b32.xlu0 %v155_v19, %s189_s29 }
  0x24   :  { %126 = vrot.lane.b32.xlu0 %v157_v21, %s191_s0 }
  0x74   :  { %v35_v23 = vpop.permute.xlu1 %34  }
  0x76   :  { %v12_v22 = vpop.permute.xlu0 %11  }
  0x77   :  { %15 = vst.msk [vmem:[#allocation0 + $0x1] sm:$0x1] %vm13_vm3, %v12_v22   ;;  %vm115_vm3 = vcmask 294032  }
  0x78   :  { %17 = vst.msk [vmem:[#allocation0] sm:$0x1] %vm16_vm4, %v12_v22   ;;  %v41_v25 = vpop.permute.xlu1 %40   ;;  %vm121_vm4 = vcmask 277632  }
  0x79   :  { %37 = vst.msk [vmem:[#allocation0] sm:$0x1] %vm36_vm5, %v35_v23   ;;  %vm128_vm5 = vcmask 261232  }
  0x7a   :  { %v25_v24 = vpop.permute.xlu0 %24  }
  0x7b   :  { %28 = vst.msk [vmem:[#allocation0 + $0x2] sm:$0x1] %vm26_vm6, %v25_v24  }
  0x7c   :  { %31 = vst.msk [vmem:[#allocation0 + $0x1] sm:$0x1] %vm29_vm7, %v25_v24   ;;  %v54_v27 = vpop.permute.xlu1 %53  }
  0x7d   :  { %44 = vst.msk [vmem:[#allocation0 + $0x1] sm:$0x1] %vm42_vm8, %v41_v25  }
  0x7e   :  { %v48_v26 = vpop.permute.xlu0 %47   ;;  %57 = vst.msk [vmem:[#allocation0 + $0x1] sm:$0x1] %vm55_vm10, %v54_v27  }
  0x7f   :  { %50 = vst.msk [vmem:[#allocation0] sm:$0x1] %vm49_vm9, %v48_v26  }
  0x80   :  { %v67_v29 = vpop.permute.xlu1 %66  }
  0x81   :  { %70 = vst.msk [vmem:[#allocation0 + $0x1] sm:$0x1] %vm68_vm12, %v67_v29  }
  0x82   :  { %v61_v28 = vpop.permute.xlu0 %60  }
  0x83   :  { %63 = vst.msk [vmem:[#allocation0] sm:$0x1] %vm62_vm11, %v61_v28  }
  0x84   :  { %v80_v31 = vpop.permute.xlu1 %79  }
  0x85   :  { %83 = vst.msk [vmem:[#allocation0 + $0x1] sm:$0x1] %vm81_vm14, %v80_v31  }
  0x86   :  { %v74_v30 = vpop.permute.xlu0 %73  }
  0x87   :  { %76 = vst.msk [vmem:[#allocation0] sm:$0x1] %vm75_vm13, %v74_v30  }
  0x88   :  { %v94_v33 = vpop.permute.xlu1 %93  }
  0x89   :  { %96 = vst.msk [vmem:[#allocation0] sm:$0x1] %vm95_vm0, %v94_v33  }
  0x8a   :  { %v87_v32 = vpop.permute.xlu0 %86  }
  0x8b   :  { %90 = vst.msk [vmem:[#allocation0 + $0x2] sm:$0x1] %vm88_vm15, %v87_v32  }
  0x8c   :  { %v107_v35 = vpop.permute.xlu1 %106  }
  0x8d   :  { %110 = vst.msk [vmem:[#allocation0 + $0x2] sm:$0x1] %vm108_vm2, %v107_v35  }
  0x8e   :  { %v100_v34 = vpop.permute.xlu0 %99  }
  0x8f   :  { %103 = vst.msk [vmem:[#allocation0 + $0x1] sm:$0x1] %vm101_vm1, %v100_v34  }
  0x90   :  { %v120_v37 = vpop.permute.xlu1 %119  }
  0x91   :  { %123 = vst.msk [vmem:[#allocation0 + $0x1] sm:$0x1] %vm121_vm4, %v120_v37  }
  0x92   :  { %v114_v36 = vpop.permute.xlu0 %113  }
  0x93   :  { %116 = vst.msk [vmem:[#allocation0] sm:$0x1] %vm115_vm3, %v114_v36  }
  0x96   :  { %v127_v38 = vpop.permute.xlu0 %126  }
  0x97   :  { %130 = vst.msk [vmem:[#allocation0 + $0x2] sm:$0x1] %vm128_vm5, %v127_v38  }
  0x9e   :  { %v135_v39 = vld [vmem:[#allocation0] sm:$0xf] }
  0x9f   :  { %138 = vst [vmem:[%s266_s1] sm:$0xf] %v135_v39 }

// kernel: tile.7
= control target key start
LH: loop header
LB: loop body
LE: loop exit
PB: predicated region body
PF: predicated region fallthrough
CT: control target
= control target key end

     0   :  { %vm28_vm0 = vcmask 490496   ;;  %vm18_vm1 = vcmask 556032   ;;  %s39_s12 = smov 3  ;;  %s54_s13 = smov 68   ;;  %vm32_vm2 = vcmask 64512   ;;  %vm35_vm3 = vcmask 1048096   ;;  %s91_s0 = inlined_call_operand.vmem [shape: f32[2,324], index: 0, kind: input, shape index: {}]   ;;  %s92_s1 = inlined_call_operand.vmem [shape: f32[648], index: 1, kind: output, shape index: {}]  }
   0x1   :  { %v47_v0 = vld [vmem:[%s91_s0 + $0x4] sm:$0x3]  ;;  %v48_v1 = vld [vmem:[%s91_s0 + $0x2] sm:$0x3]  ;;  %v14_v2 = vld [vmem:[%s91_s0] sm:$0x3] }
   0x2   :  { %9 = vst [vmem:[#allocation0 + $0x10] sm:$0x3] %v47_v0  ;;  %13 = vst [vmem:[#allocation0 + $0x8] sm:$0x3] %v48_v1  ;;  %s21_s0 = smov 3 }
   0x3   :  { %15 = vst [vmem:[#allocation0] sm:$0x3] %v14_v2 }
   0x9   :  { %v25_v3 = vld [vmem:[#allocation0 + $0x11] sm:$0x1]   ;;  %v17_v7 = vld [vmem:[#allocation0 + $0x10] sm:$0x1]  }
   0xa   :  { %v27_v4 = vld [vmem:[#allocation0 + $0x1] ss:$8 sm:$0x7]   ;;  %v22_v6 = vld [vmem:[#allocation0] ss:$8 sm:%s21_s0]  }
   0xb   :  { %v29_v5 = vsel %vm28_vm0, %v27_v4, %v25_v3  ;;  %23 = vst [vmem:[%s92_s1] sm:$0x3] %v22_v6   ;;  %49 = vst.msk [vmem:[%s92_s1 + $0x2] sm:$0x1] %vm18_vm1, %v17_v7   ;;  %v40_v8 = vld [vmem:[#allocation0 + $0x1] ss:$8 sm:%s39_s12]  }
   0xc   :  { %30 = vrot.lane.b32.xlu0 %v29_v5, %s54_s13 }
  0x10   :  { %41 = vrot.lane.b32.xlu0 %v40_v8, %s54_s13 }
  0x7e   :  { %v31_v9 = vpop.permute.xlu0 %30  }
  0x7f   :  { %50 = vst.msk [vmem:[%s92_s1 + $0x5] sm:$0x1] %vm32_vm2, %v31_v9  }
  0x80   :  { %51 = vst.msk [vmem:[%s92_s1 + $0x2] sm:$0x7] %vm35_vm3, %v31_v9  }
  0x82   :  { %v42_v10 = vpop.permute.xlu0 %41  }
  0x83   :  { %52 = vst.msk [vmem:[%s92_s1 + $0x3] sm:$0x3] %vm18_vm1, %v42_v10  }

// kernel: tile.6
= control target key start
LH: loop header
LB: loop body
LE: loop exit
PB: predicated region body
PF: predicated region fallthrough
CT: control target
= control target key end

     0   :  { %s46_s0 = inlined_call_operand.vmem [shape: f32[324], index: 0, kind: input, shape index: {}]   ;;  %s47_s1 = inlined_call_operand.vmem [shape: f32[2,324], index: 1, kind: output, shape index: {}]  }
   0x1   :  { %v4_v0 = vld [vmem:[%s46_s0] ss:$0 sm:$0xff]  ;;  %v14_v1 = vld [vmem:[%s46_s0 + $0x1] ss:$0 sm:$0xff]  ;;  %v16_v2 = vld [vmem:[%s46_s0 + $0x2] ss:$0 sm:$0xff] }
   0x2   :  { %5 = vst [vmem:[%s47_s1] sm:$0x3] %v4_v0  ;;  %15 = vst [vmem:[%s47_s1 + $0x2] sm:$0x3] %v14_v1 }
   0x3   :  { %17 = vst [vmem:[%s47_s1 + $0x4] sm:$0x3] %v16_v2 }

// kernel: demonet_forward.1
= control target key start
LH: loop header
LB: loop body
LE: loop exit
PB: predicated region body
PF: predicated region fallthrough
CT: control target
= control target key end

     0   :  { %v6821_v2 = vmov 0.0   ;;  %s5249_s9 = smov 19   ;;  %s5250_s18 = smov 18   ;;  %v5255_v7 = vmov 0   ;;  %v37_v10 = vlaneseq  ;;  %vm102_vm1 = vcmask 64512   ;;  %s6812_s0 = inlined_call_operand.vmem [shape: f32[8,768], index: 0, kind: input, shape index: {}]   ;;  %s6813_s2 = inlined_call_operand.vmem [shape: f32[16,1], index: 2, kind: input, shape index: {}]   ;;  %s6814_s1 = inlined_call_operand.vmem [shape: f32[9,16,8], index: 1, kind: input, shape index: {}]   ;;  %s6815_s7 = inlined_call_operand.vmem [shape: f32[1,768], index: 7, kind: input, shape index: {}]   ;;  %s6816_s3 = inlined_call_operand.vmem [shape: f32[16,1], index: 3, kind: input, shape index: {}]   ;;  %s6817_s4 = inlined_call_operand.vmem [shape: f32[16,1], index: 4, kind: input, shape index: {}]   ;;  %s6818_s6 = inlined_call_operand.vmem [shape: f32[8,1], index: 6, kind: input, shape index: {}]   ;;  %s6819_s5 = inlined_call_operand.vmem [shape: f32[9,8,16], index: 5, kind: input, shape index: {}]   ;;  %s6820_s8 = inlined_call_operand.vmem [shape: f32[8,768], index: 8, kind: output, shape index: {}]  }
   0x1   :  { %v5306_v0 = vld [vmem:[%s6812_s0 + $0x28] sm:$0xff]  ;;  %v5311_v1 = vld [vmem:[%s6812_s0] sm:$0xff]  ;;  %173 = vmatprep.mubr.f32.mxu0 %v6821_v2  ;;  %250 = vmatprep.mubr.f32.mxu1 %v6821_v2  ;;  %v5322_v3 = vld [vmem:[%s6812_s0 + $0x10] sm:$0xff]  ;;  %s5252_s19 = smov 1   ;;  %s5253_s20 = smov 127   ;;  %vm2706_vm9 = vcmask 130048  }
   0x2   :  { %91 = vrot.lane.b32.xlu1 %v5306_v0, %s5249_s9  ;;  %81 = vrot.lane.b32.xlu0 %v5311_v1, %s5249_s9  ;;  %v5327_v4 = vld [vmem:[%s6812_s0 + $0x8] sm:$0xff]  ;;  %v5336_v5 = vld [vmem:[%s6812_s0 + $0x20] sm:$0xff]  ;;  %s5254_s21 = smov 111   ;;  %s5256_s22 = smov 110   ;;  %v5438_v11 = vand.u32 127, %v37_v10 }
   0x3   :  { %v5341_v6 = vld [vmem:[%s6812_s0 + $0x18] sm:$0xff]  ;;  %s5251_s0 = smov 17   ;;  %5219 = vset.pattern.permute.xlu1 %v5255_v7  ;;  %5218 = vset.pattern.permute.xlu0 %v5255_v7  ;;  %s5257_s23 = smov 109   ;;  %v67_v8 = vld [vmem:[%s6813_s2] sm:$0xff]  ;;  %v68_v9 = vld [vmem:[%s6813_s2 + $0x8] sm:$0xff] }
   0x4   :  { %6828 = vst [vmem:[#allocation2_spill] sm:$0xff] %v5438_v11  ;;  %vm95_vm0 = vcmp.lt.s32.totalorder %v5438_v11, 19  ;;  %v79_v17 = vld [vmem:[%s6814_s1] sm:$0xff]  ;;  %v80_v24 = vld [vmem:[%s6814_s1 + $0x8] sm:$0xff]  ;;  %vm367_vm2 = vcmp.lt.s32.totalorder %v5438_v11, 18  ;;  %v5109_v32 = vld [vmem:[%s6814_s1 + $0x10] sm:$0xff] }
   0x5   :  { %v5110_v38 = vld [vmem:[%s6814_s1 + $0x18] sm:$0xff]  ;;  %vm638_vm3 = vcmp.lt.s32.totalorder %v5438_v11, 17  ;;  %v5117_v46 = vld [vmem:[%s6814_s1 + $0x20] sm:$0xff]  ;;  %v5118_v52 = vld [vmem:[%s6814_s1 + $0x28] sm:$0xff]  ;;  %vm909_vm4 = vcmp.lt.s32.totalorder %v5438_v11, 1  ;;  %vm1432_vm5 = vcmp.lt.s32.totalorder %v5438_v11, 127 }
   0x6   :  { %85 = vrot.lane.b32.xlu1 %v5322_v3, %s5249_s9  ;;  %83 = vrot.lane.b32.xlu0 %v5327_v4, %s5249_s9  ;;  %v5125_v60 = vld [vmem:[%s6814_s1 + $0x30] sm:$0xff]  ;;  %vm1703_vm6 = vcmp.lt.s32.totalorder %v5438_v11, 111  ;;  %vm1974_vm7 = vcmp.lt.s32.totalorder %v5438_v11, 110  ;;  %vm2245_vm8 = vcmp.lt.s32.totalorder %v5438_v11, 109  ;;  %v38_v11 = vshrl.u32 %v37_v10, 7 }
   0x8   :  { %v51_v10 = vsub.s32 3, %v38_v11 }
   0xa   :  { %89 = vrot.lane.b32.xlu1 %v5336_v5, %s5249_s9  ;;  %87 = vrot.lane.b32.xlu0 %v5341_v6, %s5249_s9 }
   0xe   :  { %357 = vrot.lane.b32.xlu1 %v5327_v4, %s5250_s18  ;;  %355 = vrot.lane.b32.xlu0 %v5311_v1, %s5250_s18 }
  0x12   :  { %359 = vrot.lane.b32.xlu1 %v5322_v3, %s5250_s18  ;;  %365 = vrot.lane.b32.xlu0 %v5306_v0, %s5250_s18 }
  0x16   :  { %363 = vrot.lane.b32.xlu1 %v5336_v5, %s5250_s18  ;;  %361 = vrot.lane.b32.xlu0 %v5341_v6, %s5250_s18 }
  0x1a   :  { %628 = vrot.lane.b32.xlu1 %v5327_v4, %s5251_s0  ;;  %626 = vrot.lane.b32.xlu0 %v5311_v1, %s5251_s0 }
  0x1e   :  { %630 = vrot.lane.b32.xlu1 %v5322_v3, %s5251_s0  ;;  %636 = vrot.lane.b32.xlu0 %v5306_v0, %s5251_s0 }
  0x22   :  { %634 = vrot.lane.b32.xlu1 %v5336_v5, %s5251_s0  ;;  %632 = vrot.lane.b32.xlu0 %v5341_v6, %s5251_s0 }
  0x26   :  { %899 = vrot.lane.b32.xlu1 %v5327_v4, %s5252_s19  ;;  %897 = vrot.lane.b32.xlu0 %v5311_v1, %s5252_s19 }
  0x2a   :  { %901 = vrot.lane.b32.xlu1 %v5322_v3, %s5252_s19  ;;  %907 = vrot.lane.b32.xlu0 %v5306_v0, %s5252_s19 }
  0x2e   :  { %905 = vrot.lane.b32.xlu1 %v5336_v5, %s5252_s19  ;;  %903 = vrot.lane.b32.xlu0 %v5341_v6, %s5252_s19 }
  0x32   :  { %1422 = vrot.lane.b32.xlu0 %v5327_v4, %s5253_s20  ;;  %1424 = vrot.lane.b32.xlu1 %v5322_v3, %s5253_s20 }
  0x36   :  { %1420 = vrot.lane.b32.xlu0 %v5311_v1, %s5253_s20  ;;  %1426 = vrot.lane.b32.xlu1 %v5341_v6, %s5253_s20 }
  0x3a   :  { %1428 = vrot.lane.b32.xlu0 %v5336_v5, %s5253_s20  ;;  %1430 = vrot.lane.b32.xlu1 %v5306_v0, %s5253_s20 }
  0x3e   :  { %1693 = vrot.lane.b32.xlu0 %v5327_v4, %s5254_s21  ;;  %1695 = vrot.lane.b32.xlu1 %v5322_v3, %s5254_s21 }
  0x42   :  { %1691 = vrot.lane.b32.xlu0 %v5311_v1, %s5254_s21  ;;  %1697 = vrot.lane.b32.xlu1 %v5341_v6, %s5254_s21 }
  0x46   :  { %1699 = vrot.lane.b32.xlu0 %v5336_v5, %s5254_s21  ;;  %1701 = vrot.lane.b32.xlu1 %v5306_v0, %s5254_s21 }
  0x4a   :  { %1964 = vrot.lane.b32.xlu0 %v5327_v4, %s5256_s22  ;;  %1966 = vrot.lane.b32.xlu1 %v5322_v3, %s5256_s22 }
  0x4e   :  { %1962 = vrot.lane.b32.xlu0 %v5311_v1, %s5256_s22  ;;  %1968 = vrot.lane.b32.xlu1 %v5341_v6, %s5256_s22 }
  0x52   :  { %1970 = vrot.lane.b32.xlu0 %v5336_v5, %s5256_s22  ;;  %1972 = vrot.lane.b32.xlu1 %v5306_v0, %s5256_s22 }
  0x56   :  { %2235 = vrot.lane.b32.xlu0 %v5327_v4, %s5257_s23  ;;  %2237 = vrot.lane.b32.xlu1 %v5322_v3, %s5257_s23 }
  0x5a   :  { %2233 = vrot.lane.b32.xlu0 %v5311_v1, %s5257_s23  ;;  %2239 = vrot.lane.b32.xlu1 %v5341_v6, %s5257_s23 }
  0x5e   :  { %2241 = vrot.lane.b32.xlu0 %v5336_v5, %s5257_s23  ;;  %2243 = vrot.lane.b32.xlu1 %v5306_v0, %s5257_s23 }
  0x62   :  { %71 = vperm.xlu1 %5219, %v67_v8   ;;  %76 = vperm.xlu0 %5218, %v68_v9   ;;  %v5126_v9 = vld [vmem:[%s6814_s1 + $0x38] sm:$0xff] }
  0x74   :  { %v92_v12 = vpop.permute.xlu1 %91  ;;  %v82_v13 = vpop.permute.xlu0 %81 }
  0x75   :  { %v101_v18 = vsel %vm95_vm0, %v92_v12, %v82_v13 }
  0x78   :  { %v86_v14 = vpop.permute.xlu1 %85  ;;  %v84_v15 = vpop.permute.xlu0 %83 }
  0x79   :  { %v100_v16 = vsel %vm95_vm0, %v82_v13, %v84_v15  ;;  %v99_v25 = vsel %vm95_vm0, %v84_v15, %v86_v14 }
  0x7a   :  { %139 = vmatprep.subr.mxu0 %v100_v16 }
  0x7b   :  { %140 = vmatpush1.msra.mxu0 %v101_v18  ;;  %v5134_v18 = vld [vmem:[%s6814_s1 + $0x48] sm:$0xff] }
  0x7c   :  { %v90_v19 = vpop.permute.xlu1 %89  ;;  %5103 = vmatmul.mubr.msk.f32.vlgmr.msra.gmra.mxu0 %vm102_vm1, %v79_v17  ;;  %v88_v20 = vpop.permute.xlu0 %87 }
  0x7d   :  { %v98_v21 = vsel %vm95_vm0, %v86_v14, %v88_v20  ;;  %v96_v22 = vsel %vm95_vm0, %v90_v19, %v92_v12  ;;  %179 = vmatprep.mubr.f32.mxu0 %v6821_v2  ;;  %v97_v23 = vsel %vm95_vm0, %v88_v20, %v90_v19 }
  0x7e   :  { %216 = vmatprep.subr.mxu1 %v98_v21  ;;  %293 = vmatprep.subr.mxu0 %v96_v22 }
  0x7f   :  { %217 = vmatpush1.msra.mxu1 %v99_v25  ;;  %294 = vmatpush1.msra.mxu0 %v97_v23  ;;  %v5141_v25 = vld [vmem:[%s6814_s1 + $0x50] sm:$0xff] }
  0x80   :  { %v358_v26 = vpop.permute.xlu1 %357  ;;  %5104 = vmatmul.mubr.msk.f32.gmra.mxu0 %vm102_vm1, %v80_v24  ;;  %5105 = vmatmul.mubr.msk.f32.vlgmr.msra.gmra.mxu1 %vm102_vm1, %v79_v17  ;;  %v356_v27 = vpop.permute.xlu0 %355 }
  0x81   :  { %v372_v28 = vsel %vm367_vm2, %v356_v27, %v358_v26  ;;  %256 = vmatprep.mubr.f32.mxu1 %v6821_v2  ;;  %327 = vmatprep.mubr.f32.mxu0 %v6821_v2 }
  0x82   :  { %410 = vmatprep.subr.mxu1 %v372_v28 }
  0x84   :  { %v360_v29 = vpop.permute.xlu1 %359  ;;  %5106 = vmatmul.mubr.msk.f32.gmra.mxu1 %vm102_vm1, %v80_v24  ;;  %5107 = vmatmul.mubr.msk.f32.vlgmr.msra.gmra.mxu0 %vm102_vm1, %v79_v17  ;;  %v366_v30 = vpop.permute.xlu0 %365 }
  0x85   :  { %v373_v31 = vsel %vm367_vm2, %v366_v30, %v356_v27  ;;  %333 = vmatprep.mubr.f32.mxu0 %v6821_v2  ;;  %444 = vmatprep.mubr.f32.mxu1 %v6821_v2  ;;  %v371_v39 = vsel %vm367_vm2, %v358_v26, %v360_v29 }
  0x86   :  { %411 = vmatpush1.msra.mxu1 %v373_v31 }
  0x88   :  { %v364_v33 = vpop.permute.xlu1 %363  ;;  %5108 = vmatmul.mubr.msk.f32.gmra.mxu0 %vm102_vm1, %v80_v24  ;;  %5111 = vmatmul.mubr.msk.f32.vlgmr.msra.gmra.mxu1 %vm102_vm1, %v5109_v32  ;;  %v362_v34 = vpop.permute.xlu0 %361 }
  0x89   :  { %v370_v35 = vsel %vm367_vm2, %v360_v29, %v362_v34  ;;  %v368_v36 = vsel %vm367_vm2, %v364_v33, %v366_v30  ;;  %450 = vmatprep.mubr.f32.mxu1 %v6821_v2  ;;  %521 = vmatprep.mubr.f32.mxu0 %v6821_v2  ;;  %v369_v37 = vsel %vm367_vm2, %v362_v34, %v364_v33  ;;  %v5142_v29 = vld [vmem:[%s6814_s1 + $0x58] sm:$0xff] }
  0x8a   :  { %487 = vmatprep.subr.mxu0 %v370_v35  ;;  %564 = vmatprep.subr.mxu1 %v368_v36 }
  0x8b   :  { %488 = vmatpush1.msra.mxu0 %v371_v39  ;;  %565 = vmatpush1.msra.mxu1 %v369_v37  ;;  %v5149_v39 = vld [vmem:[%s6814_s1 + $0x60] sm:$0xff] }
  0x8c   :  { %v629_v40 = vpop.permute.xlu1 %628  ;;  %5112 = vmatmul.mubr.msk.f32.gmra.mxu1 %vm102_vm1, %v5110_v38  ;;  %5113 = vmatmul.mubr.msk.f32.vlgmr.msra.gmra.mxu0 %vm102_vm1, %v5109_v32  ;;  %v627_v41 = vpop.permute.xlu0 %626 }
  0x8d   :  { %v643_v42 = vsel %vm638_vm3, %v627_v41, %v629_v40  ;;  %527 = vmatprep.mubr.f32.mxu0 %v6821_v2  ;;  %598 = vmatprep.mubr.f32.mxu1 %v6821_v2 }
  0x8e   :  { %681 = vmatprep.subr.mxu0 %v643_v42 }
  0x90   :  { %v631_v43 = vpop.permute.xlu1 %630  ;;  %5114 = vmatmul.mubr.msk.f32.gmra.mxu0 %vm102_vm1, %v5110_v38  ;;  %5115 = vmatmul.mubr.msk.f32.vlgmr.msra.gmra.mxu1 %vm102_vm1, %v5109_v32  ;;  %v637_v44 = vpop.permute.xlu0 %636 }
  0x91   :  { %v644_v45 = vsel %vm638_vm3, %v637_v44, %v627_v41  ;;  %604 = vmatprep.mubr.f32.mxu1 %v6821_v2  ;;  %715 = vmatprep.mubr.f32.mxu0 %v6821_v2  ;;  %v642_v53 = vsel %vm638_vm3, %v629_v40, %v631_v43 }
  0x92   :  { %682 = vmatpush1.msra.mxu0 %v644_v45 }
  0x94   :  { %v635_v47 = vpop.permute.xlu1 %634  ;;  %5116 = vmatmul.mubr.msk.f32.gmra.mxu1 %vm102_vm1, %v5110_v38  ;;  %5119 = vmatmul.mubr.msk.f32.vlgmr.msra.gmra.mxu0 %vm102_vm1, %v5117_v46  ;;  %v633_v48 = vpop.permute.xlu0 %632 }
  0x95   :  { %v641_v49 = vsel %vm638_vm3, %v631_v43, %v633_v48  ;;  %v639_v50 = vsel %vm638_vm3, %v635_v47, %v637_v44  ;;  %721 = vmatprep.mubr.f32.mxu0 %v6821_v2  ;;  %792 = vmatprep.mubr.f32.mxu1 %v6821_v2  ;;  %v640_v51 = vsel %vm638_vm3, %v633_v48, %v635_v47  ;;  %v5150_v43 = vld [vmem:[%s6814_s1 + $0x68] sm:$0xff] }
  0x96   :  { %758 = vmatprep.subr.mxu1 %v641_v49  ;;  %835 = vmatprep.subr.mxu0 %v639_v50 }
  0x97   :  { %759 = vmatpush1.msra.mxu1 %v642_v53  ;;  %836 = vmatpush1.msra.mxu0 %v640_v51  ;;  %v5157_v53 = vld [vmem:[%s6814_s1 + $0x70] sm:$0xff] }
  0x98   :  { %v900_v54 = vpop.permute.xlu1 %899  ;;  %5120 = vmatmul.mubr.msk.f32.gmra.mxu0 %vm102_vm1, %v5118_v52  ;;  %5121 = vmatmul.mubr.msk.f32.vlgmr.msra.gmra.mxu1 %vm102_vm1, %v5117_v46  ;;  %v898_v55 = vpop.permute.xlu0 %897 }
  0x99   :  { %v914_v56 = vsel %vm909_vm4, %v898_v55, %v900_v54  ;;  %798 = vmatprep.mubr.f32.mxu1 %v6821_v2  ;;  %869 = vmatprep.mubr.f32.mxu0 %v6821_v2 }
  0x9a   :  { %952 = vmatprep.subr.mxu1 %v914_v56 }
  0x9c   :  { %v902_v57 = vpop.permute.xlu1 %901  ;;  %5122 = vmatmul.mubr.msk.f32.gmra.mxu1 %vm102_vm1, %v5118_v52  ;;  %5123 = vmatmul.mubr.msk.f32.vlgmr.msra.gmra.mxu0 %vm102_vm1, %v5117_v46  ;;  %v908_v58 = vpop.permute.xlu0 %907 }
  0x9d   :  { %v915_v59 = vsel %vm909_vm4, %v908_v58, %v898_v55  ;;  %875 = vmatprep.mubr.f32.mxu0 %v6821_v2  ;;  %986 = vmatprep.mubr.f32.mxu1 %v6821_v2  ;;  %v913_v12 = vsel %vm909_vm4, %v900_v54, %v902_v57 }
  0x9e   :  { %953 = vmatpush1.msra.mxu1 %v915_v59 }
  0xa0   :  { %v906_v61 = vpop.permute.xlu1 %905  ;;  %5124 = vmatmul.mubr.msk.f32.gmra.mxu0 %vm102_vm1, %v5118_v52  ;;  %5127 = vmatmul.mubr.msk.f32.vlgmr.msra.gmra.mxu1 %vm102_vm1, %v5125_v60  ;;  %v904_v62 = vpop.permute.xlu0 %903 }
  0xa1   :  { %v912_v63 = vsel %vm909_vm4, %v902_v57, %v904_v62  ;;  %v910_v7 = vsel %vm909_vm4, %v906_v61, %v908_v58  ;;  %992 = vmatprep.mubr.f32.mxu1 %v6821_v2  ;;  %1063 = vmatprep.mubr.f32.mxu0 %v6821_v2  ;;  %v911_v8 = vsel %vm909_vm4, %v904_v62, %v906_v61  ;;  %v5158_v57 = vld [vmem:[%s6814_s1 + $0x78] sm:$0xff]  ;;  %v5165_v62 = vld [vmem:[%s6814_s1 + $0x80] sm:$0xff] }
  0xa2   :  { %1029 = vmatprep.subr.mxu0 %v912_v63  ;;  %1106 = vmatprep.subr.mxu1 %v910_v7  ;;  %v5166_v7 = vld [vmem:[%s6814_s1 + $0x88] sm:$0xff] }
  0xa3   :  { %1030 = vmatpush1.msra.mxu0 %v913_v12  ;;  %1107 = vmatpush1.msra.mxu1 %v911_v8 }
  0xa4   :  { %5128 = vmatmul.mubr.msk.f32.gmra.mxu1 %vm102_vm1, %v5126_v9  ;;  %5129 = vmatmul.mubr.msk.f32.vlgmr.msra.gmra.mxu0 %vm102_vm1, %v5125_v60  ;;  %v1423_v13 = vpop.permute.xlu0 %1422  ;;  %v1425_v14 = vpop.permute.xlu1 %1424 }
  0xa5   :  { %1069 = vmatprep.mubr.f32.mxu0 %v6821_v2  ;;  %1140 = vmatprep.mubr.f32.mxu1 %v6821_v2  ;;  %v1436_v17 = vsel %vm1432_vm5, %v1423_v13, %v1425_v14 }
  0xa6   :  { %1204 = vmatprep.subr.mxu0 %v5327_v4  ;;  %1281 = vmatprep.subr.mxu1 %v5341_v6  ;;  %v5133_v4 = vld [vmem:[%s6814_s1 + $0x40] sm:$0xff] }
  0xa7   :  { %1205 = vmatpush1.msra.mxu0 %v5311_v1 }
  0xa8   :  { %5130 = vmatmul.mubr.msk.f32.gmra.mxu0 %vm102_vm1, %v5126_v9  ;;  %5131 = vmatmul.mubr.msk.f32.vlgmr.msra.gmra.mxu1 %vm102_vm1, %v5125_v60  ;;  %v1421_v15 = vpop.permute.xlu0 %1420  ;;  %v1427_v16 = vpop.permute.xlu1 %1426 }
  0xa9   :  { %1146 = vmatprep.mubr.f32.mxu1 %v6821_v2  ;;  %1238 = vmatprep.mubr.f32.mxu0 %v6821_v2 }
  0xaa   :  { %1282 = vmatpush1.msra.mxu1 %v5322_v3  ;;  %1358 = vmatprep.subr.mxu0 %v5306_v0  ;;  %v1437_v0 = vsel %vm1432_vm5, %v1421_v15, %v1423_v13 }
  0xab   :  { %1475 = vmatprep.subr.mxu1 %v1436_v17 }
  0xac   :  { %5132 = vmatmul.mubr.msk.f32.gmra.mxu1 %vm102_vm1, %v5126_v9  ;;  %5135 = vmatmul.mubr.msk.f32.vlgmr.msra.gmra.mxu0 %vm102_vm1, %v5133_v4  ;;  %v1429_v1 = vpop.permute.xlu0 %1428  ;;  %v1431_v6 = vpop.permute.xlu1 %1430 }
  0xad   :  { %1244 = vmatprep.mubr.f32.mxu0 %v6821_v2  ;;  %1315 = vmatprep.mubr.f32.mxu1 %v6821_v2  ;;  %v1434_v3 = vsel %vm1432_vm5, %v1427_v16, %v1429_v1  ;;  %v1438_v19 = vsel %vm1432_vm5, %v1431_v6, %v1421_v15  ;;  %v1433_v26 = vsel %vm1432_vm5, %v1429_v1, %v1431_v6 }
  0xae   :  { %1359 = vmatpush1.msra.mxu0 %v5336_v5  ;;  %v1435_v5 = vsel %vm1432_vm5, %v1425_v14, %v1427_v16 }
  0xaf   :  { %1552 = vmatprep.subr.mxu0 %v1434_v3 }
  0xb0   :  { %5136 = vmatmul.mubr.msk.f32.gmra.mxu0 %vm102_vm1, %v5134_v18  ;;  %5137 = vmatmul.mubr.msk.f32.vlgmr.msra.gmra.mxu1 %vm102_vm1, %v5133_v4  ;;  %v1694_v20 = vpop.permute.xlu0 %1693  ;;  %v1696_v21 = vpop.permute.xlu1 %1695 }
  0xb1   :  { %1476 = vmatpush1.msra.mxu1 %v1437_v0  ;;  %1321 = vmatprep.mubr.f32.mxu1 %v6821_v2  ;;  %v1707_v22 = vsel %vm1703_vm6, %v1694_v20, %v1696_v21 }
  0xb2   :  { %1392 = vmatprep.mubr.f32.mxu0 %v6821_v2  ;;  %1629 = vmatprep.subr.mxu1 %v1438_v19 }
  0xb4   :  { %5138 = vmatmul.mubr.msk.f32.gmra.mxu1 %vm102_vm1, %v5134_v18  ;;  %5139 = vmatmul.mubr.msk.f32.vlgmr.msra.gmra.mxu0 %vm102_vm1, %v5133_v4  ;;  %v1692_v23 = vpop.permute.xlu0 %1691  ;;  %v1698_v24 = vpop.permute.xlu1 %1697 }
  0xb5   :  { %1553 = vmatpush1.msra.mxu0 %v1435_v5  ;;  %1398 = vmatprep.mubr.f32.mxu0 %v6821_v2  ;;  %v1708_v31 = vsel %vm1703_vm6, %v1692_v23, %v1694_v20  ;;  %v1706_v35 = vsel %vm1703_vm6, %v1696_v21, %v1698_v24 }
  0xb6   :  { %1509 = vmatprep.mubr.f32.mxu1 %v6821_v2  ;;  %1746 = vmatprep.subr.mxu0 %v1707_v22 }
  0xb8   :  { %5140 = vmatmul.mubr.msk.f32.gmra.mxu0 %vm102_vm1, %v5134_v18  ;;  %5143 = vmatmul.mubr.msk.f32.vlgmr.msra.gmra.mxu1 %vm102_vm1, %v5141_v25  ;;  %v1700_v27 = vpop.permute.xlu0 %1699  ;;  %v1702_v28 = vpop.permute.xlu1 %1701 }
  0xb9   :  { %1630 = vmatpush1.msra.mxu1 %v1433_v26  ;;  %1515 = vmatprep.mubr.f32.mxu1 %v6821_v2  ;;  %v1705_v30 = vsel %vm1703_vm6, %v1698_v24, %v1700_v27  ;;  %v1709_v32 = vsel %vm1703_vm6, %v1702_v28, %v1692_v23  ;;  %v1704_v40 = vsel %vm1703_vm6, %v1700_v27, %v1702_v28 }
  0xba   :  { %1586 = vmatprep.mubr.f32.mxu0 %v6821_v2  ;;  %1823 = vmatprep.subr.mxu1 %v1705_v30 }
  0xbc   :  { %5144 = vmatmul.mubr.msk.f32.gmra.mxu1 %vm102_vm1, %v5142_v29  ;;  %5145 = vmatmul.mubr.msk.f32.vlgmr.msra.gmra.mxu0 %vm102_vm1, %v5141_v25  ;;  %v1965_v33 = vpop.permute.xlu0 %1964  ;;  %v1967_v34 = vpop.permute.xlu1 %1966 }
  0xbd   :  { %1747 = vmatpush1.msra.mxu0 %v1708_v31  ;;  %1592 = vmatprep.mubr.f32.mxu0 %v6821_v2  ;;  %v1978_v36 = vsel %vm1974_vm7, %v1965_v33, %v1967_v34 }
  0xbe   :  { %1663 = vmatprep.mubr.f32.mxu1 %v6821_v2  ;;  %1900 = vmatprep.subr.mxu0 %v1709_v32 }
  0xc0   :  { %5146 = vmatmul.mubr.msk.f32.gmra.mxu0 %vm102_vm1, %v5142_v29  ;;  %5147 = vmatmul.mubr.msk.f32.vlgmr.msra.gmra.mxu1 %vm102_vm1, %v5141_v25  ;;  %v1963_v37 = vpop.permute.xlu0 %1962  ;;  %v1969_v38 = vpop.permute.xlu1 %1968 }
  0xc1   :  { %1824 = vmatpush1.msra.mxu1 %v1706_v35  ;;  %1669 = vmatprep.mubr.f32.mxu1 %v6821_v2  ;;  %v1979_v45 = vsel %vm1974_vm7, %v1963_v37, %v1965_v33  ;;  %v1977_v49 = vsel %vm1974_vm7, %v1967_v34, %v1969_v38 }
  0xc2   :  { %1780 = vmatprep.mubr.f32.mxu0 %v6821_v2  ;;  %2017 = vmatprep.subr.mxu1 %v1978_v36 }
  0xc4   :  { %5148 = vmatmul.mubr.msk.f32.gmra.mxu1 %vm102_vm1, %v5142_v29  ;;  %5151 = vmatmul.mubr.msk.f32.vlgmr.msra.gmra.mxu0 %vm102_vm1, %v5149_v39  ;;  %v1971_v41 = vpop.permute.xlu0 %1970  ;;  %v1973_v42 = vpop.permute.xlu1 %1972 }
  0xc5   :  { %1901 = vmatpush1.msra.mxu0 %v1704_v40  ;;  %1786 = vmatprep.mubr.f32.mxu0 %v6821_v2  ;;  %v1976_v44 = vsel %vm1974_vm7, %v1969_v38, %v1971_v41  ;;  %v1980_v46 = vsel %vm1974_vm7, %v1973_v42, %v1963_v37  ;;  %v1975_v54 = vsel %vm1974_vm7, %v1971_v41, %v1973_v42 }
  0xc6   :  { %1857 = vmatprep.mubr.f32.mxu1 %v6821_v2  ;;  %2094 = vmatprep.subr.mxu0 %v1976_v44 }
  0xc8   :  { %5152 = vmatmul.mubr.msk.f32.gmra.mxu0 %vm102_vm1, %v5150_v43  ;;  %5153 = vmatmul.mubr.msk.f32.vlgmr.msra.gmra.mxu1 %vm102_vm1, %v5149_v39  ;;  %v2236_v47 = vpop.permute.xlu0 %2235  ;;  %v2238_v48 = vpop.permute.xlu1 %2237 }
  0xc9   :  { %2018 = vmatpush1.msra.mxu1 %v1979_v45  ;;  %1863 = vmatprep.mubr.f32.mxu1 %v6821_v2  ;;  %v2249_v50 = vsel %vm2245_vm8, %v2236_v47, %v2238_v48 }
  0xca   :  { %1934 = vmatprep.mubr.f32.mxu0 %v6821_v2  ;;  %2171 = vmatprep.subr.mxu1 %v1980_v46 }
  0xcc   :  { %5154 = vmatmul.mubr.msk.f32.gmra.mxu1 %vm102_vm1, %v5150_v43  ;;  %5155 = vmatmul.mubr.msk.f32.vlgmr.msra.gmra.mxu0 %vm102_vm1, %v5149_v39  ;;  %v2234_v51 = vpop.permute.xlu0 %2233  ;;  %v2240_v52 = vpop.permute.xlu1 %2239 }
  0xcd   :  { %2095 = vmatpush1.msra.mxu0 %v1977_v49  ;;  %1940 = vmatprep.mubr.f32.mxu0 %v6821_v2  ;;  %v2250_v59 = vsel %vm2245_vm8, %v2234_v51, %v2236_v47  ;;  %v2248_v61 = vsel %vm2245_vm8, %v2238_v48, %v2240_v52 }
  0xce   :  { %2051 = vmatprep.mubr.f32.mxu1 %v6821_v2  ;;  %2288 = vmatprep.subr.mxu0 %v2249_v50 }
  0xd0   :  { %5156 = vmatmul.mubr.msk.f32.gmra.mxu0 %vm102_vm1, %v5150_v43  ;;  %5159 = vmatmul.mubr.msk.f32.vlgmr.msra.gmra.mxu1 %vm102_vm1, %v5157_v53  ;;  %v2242_v55 = vpop.permute.xlu0 %2241  ;;  %v2244_v56 = vpop.permute.xlu1 %2243 }
  0xd1   :  { %2172 = vmatpush1.msra.mxu1 %v1975_v54  ;;  %2057 = vmatprep.mubr.f32.mxu1 %v6821_v2  ;;  %v2247_v58 = vsel %vm2245_vm8, %v2240_v52, %v2242_v55  ;;  %v2251_v60 = vsel %vm2245_vm8, %v2244_v56, %v2234_v51  ;;  %v2246_v63 = vsel %vm2245_vm8, %v2242_v55, %v2244_v56 }
  0xd2   :  { %2128 = vmatprep.mubr.f32.mxu0 %v6821_v2  ;;  %2365 = vmatprep.subr.mxu1 %v2247_v58 }
  0xd4   :  { %5160 = vmatmul.mubr.msk.f32.gmra.mxu1 %vm102_vm1, %v5158_v57  ;;  %5161 = vmatmul.mubr.msk.f32.vlgmr.msra.gmra.mxu0 %vm102_vm1, %v5157_v53 }
  0xd5   :  { %2289 = vmatpush1.msra.mxu0 %v2250_v59  ;;  %2134 = vmatprep.mubr.f32.mxu0 %v6821_v2 }
  0xd6   :  { %2205 = vmatprep.mubr.f32.mxu1 %v6821_v2  ;;  %2442 = vmatprep.subr.mxu0 %v2251_v60 }
  0xd8   :  { %5162 = vmatmul.mubr.msk.f32.gmra.mxu0 %vm102_vm1, %v5158_v57  ;;  %5163 = vmatmul.mubr.msk.f32.vlgmr.msra.gmra.mxu1 %vm102_vm1, %v5157_v53 }
  0xd9   :  { %2366 = vmatpush1.msra.mxu1 %v2248_v61  ;;  %2211 = vmatprep.mubr.f32.mxu1 %v6821_v2 }
  0xda   :  { %2322 = vmatprep.mubr.f32.mxu0 %v6821_v2 }
  0xdc   :  { %5164 = vmatmul.mubr.msk.f32.gmra.mxu1 %vm102_vm1, %v5158_v57  ;;  %5167 = vmatmul.mubr.msk.f32.vlgmr.msra.gmra.mxu0 %vm102_vm1, %v5165_v62 }
  0xdd   :  { %2443 = vmatpush1.msra.mxu0 %v2246_v63  ;;  %2328 = vmatprep.mubr.f32.mxu0 %v6821_v2  ;;  %v72_v16 = vpop.permute.xlu1 %71  ;;  %v77_v18 = vpop.permute.xlu0 %76 }
  0xde   :  { %2399 = vmatprep.mubr.f32.mxu1 %v6821_v2 }
  0xe0   :  { %5168 = vmatmul.mubr.msk.f32.gmra.mxu0 %vm102_vm1, %v5166_v7  ;;  %5169 = vmatmul.mubr.msk.f32.vlgmr.msra.gmra.mxu1 %vm102_vm1, %v5165_v62 }
  0xe1   :  { %2405 = vmatprep.mubr.f32.mxu1 %v6821_v2  ;;  %2476 = vmatprep.mubr.f32.mxu0 %v6821_v2 }
  0xe4   :  { %5170 = vmatmul.mubr.msk.f32.gmra.mxu1 %vm102_vm1, %v5166_v7  ;;  %5171 = vmatmul.mubr.msk.f32.vlgmr.msra.gmra.mxu0 %vm102_vm1, %v5165_v62 }
  0xe5   :  { %2482 = vmatprep.mubr.f32.mxu0 %v6821_v2  ;;  %2774 = vmatprep.mubr.f32.mxu1 %v6821_v2 }
  0xe8   :  { %5172 = vmatmul.mubr.msk.f32.gmra.mxu0 %vm102_vm1, %v5166_v7 }
  0xe9   :  { %2916 = vmatprep.mubr.f32.mxu0 %v6821_v2 }
 0x13c   :  { %v175_v8 = vpop.f32.mrf.mxu0 }
 0x13d   :  { %v340_v3 = vadd.f32 %v175_v8, %v72_v16 }
 0x13e   :  { %v177_v9 = vpop.f32.mrf.mxu0 }
 0x13f   :  { %v341_v21 = vadd.f32 %v177_v9, %v72_v16 }
 0x140   :  { %v181_v12 = vpop.f32.mrf.mxu0  ;;  %v252_v13 = vpop.f32.mrf.mxu1 }
 0x141   :  { %v346_v24 = vadd.f32 %v181_v12, %v77_v18  ;;  %v342_v25 = vadd.f32 %v252_v13, %v72_v16 }
 0x142   :  { %v183_v14 = vpop.f32.mrf.mxu0  ;;  %v254_v15 = vpop.f32.mrf.mxu1 }
 0x143   :  { %v343_v28 = vadd.f32 %v254_v15, %v72_v16  ;;  %v347_v31 = vadd.f32 %v183_v14, %v77_v18 }
 0x144   :  { %v258_v17 = vpop.f32.mrf.mxu1  ;;  %v329_v4 = vpop.f32.mrf.mxu0 }
 0x145   :  { %v344_v34 = vadd.f32 %v329_v4, %v72_v16  ;;  %v348_v37 = vadd.f32 %v258_v17, %v77_v18 }
 0x146   :  { %v260_v1 = vpop.f32.mrf.mxu1  ;;  %v331_v6 = vpop.f32.mrf.mxu0 }
 0x147   :  { %v345_v40 = vadd.f32 %v331_v6, %v72_v16  ;;  %v349_v43 = vadd.f32 %v260_v1, %v77_v18 }
 0x148   :  { %v335_v0 = vpop.f32.mrf.mxu0  ;;  %v446_v19 = vpop.f32.mrf.mxu1 }
 0x149   :  { %v5712_v20 = vadd.f32 %v446_v19, %v340_v3  ;;  %v350_v46 = vadd.f32 %v335_v0, %v77_v18 }
 0x14a   :  { %v337_v5 = vpop.f32.mrf.mxu0  ;;  %v448_v22 = vpop.f32.mrf.mxu1 }
 0x14b   :  { %v5714_v23 = vadd.f32 %v448_v22, %v341_v21  ;;  %v351_v51 = vadd.f32 %v337_v5, %v77_v18 }
 0x14c   :  { %v452_v26 = vpop.f32.mrf.mxu1  ;;  %v523_v27 = vpop.f32.mrf.mxu0 }
 0x14d   :  { %v5716_v29 = vadd.f32 %v452_v26, %v346_v24  ;;  %v5718_v30 = vadd.f32 %v523_v27, %v342_v25 }
 0x14e   :  { %v454_v32 = vpop.f32.mrf.mxu1  ;;  %v525_v33 = vpop.f32.mrf.mxu0 }
 0x14f   :  { %v5720_v35 = vadd.f32 %v454_v32, %v347_v31  ;;  %v5722_v36 = vadd.f32 %v525_v33, %v343_v28 }
 0x150   :  { %v529_v38 = vpop.f32.mrf.mxu0  ;;  %v600_v39 = vpop.f32.mrf.mxu1 }
 0x151   :  { %v5724_v41 = vadd.f32 %v529_v38, %v348_v37  ;;  %v5726_v42 = vadd.f32 %v600_v39, %v344_v34 }
 0x152   :  { %v531_v44 = vpop.f32.mrf.mxu0  ;;  %v602_v45 = vpop.f32.mrf.mxu1 }
 0x153   :  { %v5728_v47 = vadd.f32 %v531_v44, %v349_v43  ;;  %v5730_v48 = vadd.f32 %v602_v45, %v345_v40 }
 0x154   :  { %v606_v49 = vpop.f32.mrf.mxu1  ;;  %v5732_v50 = vpop.f32.mrf.mxu0 }
 0x155   :  { %v5734_v52 = vadd.f32 %v606_v49, %v350_v46 }
 0x156   :  { %v608_v53 = vpop.f32.mrf.mxu1  ;;  %v5736_v54 = vpop.f32.mrf.mxu0 }
 0x157   :  { %v5738_v55 = vadd.f32 %v608_v53, %v351_v51 }
 0x158   :  { %v5740_v56 = vpop.f32.mrf.mxu0  ;;  %v5742_v57 = vpop.f32.mrf.mxu1 }
 0x15a   :  { %v5744_v58 = vpop.f32.mrf.mxu0  ;;  %v5746_v59 = vpop.f32.mrf.mxu1 }
 0x15c   :  { %v5748_v60 = vpop.f32.mrf.mxu1  ;;  %v5750_v61 = vpop.f32.mrf.mxu0 }
 0x15e   :  { %v5752_v62 = vpop.f32.mrf.mxu1  ;;  %v5754_v63 = vpop.f32.mrf.mxu0 }
 0x160   :  { %v5756_v7 = vpop.f32.mrf.mxu0  ;;  %v5758_v8 = vpop.f32.mrf.mxu1 }
 0x162   :  { %v5760_v9 = vpop.f32.mrf.mxu0  ;;  %v5762_v12 = vpop.f32.mrf.mxu1 }
 0x164   :  { %v5764_v13 = vpop.f32.mrf.mxu1  ;;  %v5766_v14 = vpop.f32.mrf.mxu0 }
 0x166   :  { %v5768_v15 = vpop.f32.mrf.mxu1  ;;  %v5770_v16 = vpop.f32.mrf.mxu0 }
 0x168   :  { %v5772_v17 = vpop.f32.mrf.mxu0  ;;  %v5774_v4 = vpop.f32.mrf.mxu1 }
 0x16a   :  { %v5776_v1 = vpop.f32.mrf.mxu0  ;;  %v5778_v6 = vpop.f32.mrf.mxu1 }
 0x16c   :  { %v5780_v18 = vpop.f32.mrf.mxu1  ;;  %v5782_v3 = vpop.f32.mrf.mxu0 }
 0x16e   :  { %v5784_v0 = vpop.f32.mrf.mxu1  ;;  %v5786_v19 = vpop.f32.mrf.mxu0 }
 0x170   :  { %v5788_v21 = vpop.f32.mrf.mxu0  ;;  %v5790_v5 = vpop.f32.mrf.mxu1 }
 0x172   :  { %v5792_v22 = vpop.f32.mrf.mxu0  ;;  %v5794_v24 = vpop.f32.mrf.mxu1 }
 0x174   :  { %v5796_v25 = vpop.f32.mrf.mxu1  ;;  %v5798_v26 = vpop.f32.mrf.mxu0 }
 0x176   :  { %v5800_v27 = vpop.f32.mrf.mxu1  ;;  %v5802_v28 = vpop.f32.mrf.mxu0 }
 0x177   :  { %6829 = vst [vmem:[#allocation3_spill] sm:$0xff] %v5800_v27  ;;  %6830 = vst [vmem:[#allocation4_spill] sm:$0xff] %v5802_v28 }
 0x178   :  { %v5804_v31 = vpop.f32.mrf.mxu0  ;;  %v5806_v32 = vpop.f32.mrf.mxu1 }
 0x179   :  { %6831 = vst [vmem:[#allocation5_spill] sm:$0xff] %v5804_v31 }
 0x17a   :  { %v5808_v33 = vpop.f32.mrf.mxu0  ;;  %v5810_v34 = vpop.f32.mrf.mxu1 }
 0x17b   :  { %6832 = vst [vmem:[#allocation6_spill] sm:$0xff] %v5808_v33 }
 0x17c   :  { %v5812_v37 = vpop.f32.mrf.mxu1  ;;  %v5814_v38 = vpop.f32.mrf.mxu0 }
 0x17d   :  { %6833 = vst [vmem:[#allocation7_spill] sm:$0xff] %v5812_v37  ;;  %6834 = vst [vmem:[#allocation8_spill] sm:$0xff] %v5814_v38  ;;  %v47_v38 = vsub.s32 2, %v38_v11  ;;  %v55_v37 = vsub.s32 4, %v38_v11 }
 0x17e   :  { %v5816_v39 = vpop.f32.mrf.mxu1  ;;  %v5818_v40 = vpop.f32.mrf.mxu0 }
 0x17f   :  { %6835 = vst [vmem:[#allocation9_spill] sm:$0xff] %v5816_v39  ;;  %6836 = vst [vmem:[#allocation10_spill] sm:$0xff] %v5818_v40 }
 0x180   :  { %v5820_v43 = vpop.f32.mrf.mxu0  ;;  %v5822_v44 = vpop.f32.mrf.mxu1 }
 0x181   :  { %6837 = vst [vmem:[#allocation11_spill] sm:$0xff] %v5820_v43  ;;  %6838 = vst [vmem:[#allocation12_spill] sm:$0xff] %v5822_v44 }
 0x182   :  { %v5824_v45 = vpop.f32.mrf.mxu0  ;;  %v5826_v46 = vpop.f32.mrf.mxu1 }
 0x183   :  { %6839 = vst [vmem:[#allocation13_spill] sm:$0xff] %v5824_v45  ;;  %6840 = vst [vmem:[#allocation14_spill] sm:$0xff] %v5826_v46  ;;  %v39_v45 = vsub.s32 0, %v38_v11 }
 0x184   :  { %v5828_v49 = vpop.f32.mrf.mxu1  ;;  %v5830_v51 = vpop.f32.mrf.mxu0 }
 0x185   :  { %6841 = vst [vmem:[#allocation15_spill] sm:$0xff] %v5828_v49 }
 0x186   :  { %v5832_v53 = vpop.f32.mrf.mxu1  ;;  %v5834_v2 = vpop.f32.mrf.mxu0 }
 0x187   :  { %6842 = vst [vmem:[#allocation16_spill] sm:$0xff] %v5832_v53  ;;  %6843 = vst [vmem:[#allocation17_spill] sm:$0xff] %v5834_v2  ;;  %v35_v53 = vld [vmem:[%s6815_s7] sm:$0x3f]  ;;  %v43_v2 = vsub.s32 1, %v38_v11 }
 0x188   :  { %v5837_v39 = vpop.f32.mrf.mxu0  ;;  %v5839_v40 = vpop.f32.mrf.mxu1  ;;  %v5864_v28 = vrot.slane %v35_v53, %v51_v10  ;;  %v5866_v27 = vrot.slane %v35_v53, %v55_v37  ;;  %v885_v37 = vadd.f32 %v5746_v59, %v5722_v36  ;;  %v892_v36 = vadd.f32 %v5756_v7, %v5734_v52 }
 0x189   :  { %6844 = vst [vmem:[#allocation18_spill] sm:$0xff] %v5837_v39  ;;  %6845 = vst [vmem:[#allocation19_spill] sm:$0xff] %v5839_v40  ;;  %v59_v39 = vsub.s32 5, %v38_v11  ;;  %v5860_v31 = vrot.slane %v35_v53, %v43_v2  ;;  %v882_v11 = vadd.f32 %v5732_v50, %v5712_v20  ;;  %v884_v2 = vadd.f32 %v5742_v57, %v5718_v30 }
 0x18a   :  { %v5841_v43 = vpop.f32.mrf.mxu0  ;;  %v5843_v44 = vpop.f32.mrf.mxu1  ;;  %v890_v20 = vadd.f32 %v5748_v60, %v5724_v41  ;;  %v887_v30 = vadd.f32 %v5754_v63, %v5730_v48  ;;  %v893_v41 = vadd.f32 %v5760_v9, %v5738_v55  ;;  %v1156_v48 = vadd.f32 %v5770_v16, %v885_v37 }
 0x18b   :  { %6846 = vst [vmem:[#allocation20_spill] sm:$0xff] %v5841_v43  ;;  %6847 = vst [vmem:[#allocation21_spill] sm:$0xff] %v5843_v44  ;;  %v5856_v43 = vrot.slane %v35_v53, %v39_v45  ;;  %v888_v45 = vadd.f32 %v5740_v56, %v5716_v29  ;;  %v886_v29 = vadd.f32 %v5750_v61, %v5726_v42 }
 0x18c   :  { %v5845_v46 = vpop.f32.mrf.mxu1  ;;  %v5847_v49 = vpop.f32.mrf.mxu0  ;;  %v1155_v59 = vadd.f32 %v5766_v14, %v884_v2  ;;  %v1161_v61 = vadd.f32 %v5772_v17, %v890_v20  ;;  %v1164_v9 = vadd.f32 %v5784_v0, %v893_v41  ;;  %v1408_v17 = vadd.f32 %v5794_v24, %v1156_v48  ;;  %v6857_v2 = vld [vmem:[#allocation8_spill] sm:$0xff] }
 0x18d   :  { %6848 = vst [vmem:[#allocation22_spill] sm:$0xff] %v5845_v46  ;;  %6849 = vst [vmem:[#allocation23_spill] sm:$0xff] %v5847_v49  ;;  %v5862_v49 = vrot.slane %v35_v53, %v47_v38  ;;  %v889_v38 = vadd.f32 %v5744_v58, %v5720_v35  ;;  %v1153_v35 = vadd.f32 %v5758_v8, %v882_v11  ;;  %v6856_v11 = vld [vmem:[#allocation7_spill] sm:$0xff] }
 0x18e   :  { %v5852_v33 = vpop.f32.mrf.mxu1  ;;  %v5854_v40 = vpop.f32.mrf.mxu0  ;;  %v1159_v57 = vadd.f32 %v5764_v13, %v888_v45  ;;  %v1157_v52 = vadd.f32 %v5774_v4, %v886_v29  ;;  %v1163_v8 = vadd.f32 %v5780_v18, %v892_v36 }
 0x18f   :  { %6850 = vst [vmem:[#allocation24_spill] sm:$0xff] %v5852_v33  ;;  %6851 = vst [vmem:[#allocation25_spill] sm:$0xff] %v5854_v40  ;;  %v883_v33 = vadd.f32 %v5736_v54, %v5714_v23  ;;  %v5874_v40 = vrot.slane %v35_v53, %v59_v39  ;;  %v891_v54 = vadd.f32 %v5752_v62, %v5728_v47  ;;  %v6854_v39 = vld [vmem:[#allocation5_spill] sm:$0xff]  ;;  %v6855_v53 = vld [vmem:[#allocation6_spill] sm:$0xff] }
 0x190   :  { %v5858_v44 = vpop.f32.mrf.mxu0  ;;  %v2053_v46 = vpop.f32.mrf.mxu1  ;;  %v1160_v47 = vadd.f32 %v5768_v15, %v889_v38  ;;  %v1405_v60 = vadd.f32 %v5782_v3, %v1153_v35  ;;  %v1158_v62 = vadd.f32 %v5778_v6, %v887_v30  ;;  %v1411_v14 = vadd.f32 %v5788_v21, %v1159_v57  ;;  %v6858_v38 = vld [vmem:[#allocation17_spill] sm:$0xff]  ;;  %v6862_v35 = vld [vmem:[#allocation12_spill] sm:$0xff]  ;;  %v6863_v57 = vld [vmem:[#allocation18_spill] sm:$0xff] }
 0x191   :  { %v1154_v56 = vadd.f32 %v5762_v12, %v883_v33  ;;  %v1162_v55 = vadd.f32 %v5776_v1, %v891_v54  ;;  %v1407_v15 = vadd.f32 %v5790_v5, %v1155_v59  ;;  %v1413_v6 = vadd.f32 %v5796_v25, %v1161_v61  ;;  %v6853_v33 = vld [vmem:[#allocation4_spill] sm:$0xff]  ;;  %v6861_v54 = vld [vmem:[#allocation11_spill] sm:$0xff] }
 0x192   :  { %v5884_v50 = vpop.f32.mrf.mxu0  ;;  %v2055_v23 = vpop.f32.mrf.mxu1  ;;  %v1676_v13 = vadd.f32 %v5806_v32, %v1405_v60  ;;  %v1412_v16 = vadd.f32 %v5792_v22, %v1160_v47  ;;  %v1409_v18 = vadd.f32 %v5798_v26, %v1157_v52  ;;  %v1410_v21 = vadd.f32 %v6853_v33, %v1158_v62  ;;  %v6864_v47 = vld [vmem:[#allocation19_spill] sm:$0xff]  ;;  %v6865_v52 = vld [vmem:[#allocation13_spill] sm:$0xff] }
 0x193   :  { %v1406_v12 = vadd.f32 %v5786_v19, %v1154_v56  ;;  %v6852_v19 = vld [vmem:[#allocation3_spill] sm:$0xff]  ;;  %v1415_v5 = vadd.f32 %v6854_v39, %v1163_v8  ;;  %v1416_v22 = vadd.f32 %v6855_v53, %v1164_v9  ;;  %v1682_v45 = vadd.f32 %v6856_v11, %v1411_v14 }
 0x194   :  { %v2059_v58 = vpop.f32.mrf.mxu1  ;;  %v2130_v42 = vpop.f32.mrf.mxu0  ;;  %v1947_v0 = vadd.f32 %v5830_v51, %v1676_v13  ;;  %v1414_v32 = vadd.f32 %v6852_v19, %v1162_v55  ;;  %v1678_v25 = vadd.f32 %v6857_v2, %v1407_v15  ;;  %v6860_v51 = vld [vmem:[#allocation10_spill] sm:$0xff]  ;;  %v1684_v30 = vadd.f32 %v6861_v54, %v1413_v6  ;;  %v6867_v8 = vld [vmem:[#allocation15_spill] sm:$0xff] }
 0x195   :  { %v1677_v3 = vadd.f32 %v5810_v34, %v1406_v12  ;;  %v6859_v34 = vld [vmem:[#allocation9_spill] sm:$0xff]  ;;  %v1679_v29 = vadd.f32 %v6860_v51, %v1408_v17  ;;  %v1680_v36 = vadd.f32 %v6862_v35, %v1409_v18  ;;  %v1953_v59 = vadd.f32 %v6863_v57, %v1682_v45  ;;  %v6868_v12 = vld [vmem:[#allocation20_spill] sm:$0xff]  ;;  %v6871_v19 = vld [vmem:[#allocation22_spill] sm:$0xff] }
 0x196   :  { %v2061_v63 = vpop.f32.mrf.mxu1  ;;  %v2132_v7 = vpop.f32.mrf.mxu0  ;;  %v2218_v37 = vadd.f32 %v2053_v46, %v1947_v0  ;;  %v1683_v20 = vadd.f32 %v6859_v34, %v1412_v16  ;;  %v1949_v48 = vadd.f32 %v6864_v47, %v1678_v25  ;;  %v1685_v55 = vadd.f32 %v6865_v52, %v1414_v32  ;;  %v6866_v46 = vld [vmem:[#allocation14_spill] sm:$0xff]  ;;  %v6869_v16 = vld [vmem:[#allocation16_spill] sm:$0xff]  ;;  %v6870_v0 = vld [vmem:[#allocation21_spill] sm:$0xff] }
 0x197   :  { %v1948_v26 = vadd.f32 %v6858_v38, %v1677_v3  ;;  %v1681_v62 = vadd.f32 %v6866_v46, %v1410_v21  ;;  %v1686_v9 = vadd.f32 %v6867_v8, %v1415_v5  ;;  %v1687_v17 = vadd.f32 %v6869_v16, %v1416_v22  ;;  %v6872_v39 = vld [vmem:[#allocation23_spill] sm:$0xff]  ;;  %v6874_v25 = vld [vmem:[#allocation25_spill] sm:$0xff] }
 0x198   :  { %v2136_v4 = vpop.f32.mrf.mxu0  ;;  %v2207_v1 = vpop.f32.mrf.mxu1  ;;  %v1954_v13 = vadd.f32 %v6868_v12, %v1683_v20  ;;  %v2224_v6 = vadd.f32 %v2059_v58, %v1953_v59  ;;  %v2220_v18 = vadd.f32 %v2130_v42, %v1949_v48  ;;  %v1955_v33 = vadd.f32 %v6871_v19, %v1684_v30  ;;  %v6873_v42 = vld [vmem:[#allocation24_spill] sm:$0xff] }
 0x199   :  { %v2219_v60 = vadd.f32 %v2055_v23, %v1948_v26  ;;  %v1950_v23 = vadd.f32 %v6870_v0, %v1679_v29  ;;  %v1951_v32 = vadd.f32 %v6872_v39, %v1680_v36  ;;  %v1956_v2 = vadd.f32 %v6873_v42, %v1685_v55 }
 0x19a   :  { %v2138_v10 = vpop.f32.mrf.mxu0  ;;  %v2209_v24 = vpop.f32.mrf.mxu1  ;;  %v2225_v53 = vadd.f32 %v2061_v63, %v1954_v13  ;;  %v1952_v38 = vadd.f32 %v6874_v25, %v1681_v62  ;;  %v1957_v30 = vadd.f32 %v5858_v44, %v1686_v9  ;;  %v1958_v48 = vadd.f32 %v5884_v50, %v1687_v17 }
 0x19b   :  { %v2221_v26 = vadd.f32 %v2132_v7, %v1950_v23  ;;  %v2222_v20 = vadd.f32 %v2207_v1, %v1951_v32  ;;  %v2227_v35 = vadd.f32 %v2138_v10, %v1956_v2 }
 0x19c   :  { %v2213_v41 = vpop.f32.mrf.mxu1  ;;  %v2324_v56 = vpop.f32.mrf.mxu0 }
 0x19d   :  { %v5932_v61 = vadd.f32 %v2324_v56, %v2218_v37  ;;  %v2226_v37 = vadd.f32 %v2136_v4, %v1955_v33  ;;  %v2228_v44 = vadd.f32 %v2213_v41, %v1957_v30 }
 0x19e   :  { %v2215_v14 = vpop.f32.mrf.mxu1  ;;  %v2326_v15 = vpop.f32.mrf.mxu0 }
 0x19f   :  { %v5939_v3 = vadd.f32 %v2326_v15, %v2219_v60  ;;  %v2501_v5 = vmul.f32 %v5932_v61, %v5856_v43  ;;  %v2223_v60 = vadd.f32 %v2209_v24, %v1952_v38  ;;  %v2229_v24 = vadd.f32 %v2215_v14, %v1958_v48 }
 0x1a0   :  { %v2330_v21 = vpop.f32.mrf.mxu0  ;;  %v2401_v11 = vpop.f32.mrf.mxu1 }
 0x1a1   :  { %v2502_v45 = vmul.f32 %v5939_v3, %v5860_v31  ;;  %v5948_v22 = vadd.f32 %v2330_v21, %v2224_v6  ;;  %v5950_v58 = vadd.f32 %v2401_v11, %v2220_v18 }
 0x1a2   :  { %v2332_v34 = vpop.f32.mrf.mxu0  ;;  %v2403_v63 = vpop.f32.mrf.mxu1 }
 0x1a3   :  { %v2513_v51 = vadd.f32 %v2502_v45, %v2501_v5  ;;  %v2503_v29 = vmul.f32 %v5950_v58, %v5862_v49  ;;  %v5956_v54 = vadd.f32 %v2332_v34, %v2225_v53  ;;  %v2507_v36 = vmul.f32 %v5948_v22, %v5856_v43 }
 0x1a4   :  { %v5961_v56 = vadd.f32 %v2403_v63, %v2221_v26  ;;  %v2407_v57 = vpop.f32.mrf.mxu1  ;;  %v2478_v7 = vpop.f32.mrf.mxu0 }
 0x1a5   :  { %v2514_v4 = vadd.f32 %v2513_v51, %v2503_v29  ;;  %v2508_v1 = vmul.f32 %v5956_v54, %v5860_v31  ;;  %v5965_v59 = vadd.f32 %v2407_v57, %v2226_v37  ;;  %v5967_v47 = vadd.f32 %v2478_v7, %v2222_v20 }
 0x1a6   :  { %v2504_v10 = vmul.f32 %v5961_v56, %v5864_v28  ;;  %v2409_v52 = vpop.f32.mrf.mxu1  ;;  %v2480_v55 = vpop.f32.mrf.mxu0 }
 0x1a7   :  { %v2520_v46 = vadd.f32 %v2508_v1, %v2507_v36  ;;  %v2509_v62 = vmul.f32 %v5965_v59, %v5862_v49  ;;  %v2505_v8 = vmul.f32 %v5967_v47, %v5866_v27  ;;  %v5976_v9 = vadd.f32 %v2409_v52, %v2227_v35 }
 0x1a8   :  { %v5978_v12 = vadd.f32 %v2480_v55, %v2223_v60  ;;  %v2484_v13 = vpop.f32.mrf.mxu0  ;;  %v2515_v50 = vadd.f32 %v2514_v4, %v2504_v10 }
 0x1a9   :  { %v2521_v41 = vadd.f32 %v2520_v46, %v2509_v62  ;;  %v2510_v15 = vmul.f32 %v5976_v9, %v5864_v28  ;;  %v5982_v16 = vadd.f32 %v2484_v13, %v2228_v44 }
 0x1aa   :  { %v2486_v17 = vpop.f32.mrf.mxu0  ;;  %v2506_v6 = vmul.f32 %v5978_v12, %v5874_v40  ;;  %v2516_v18 = vadd.f32 %v2515_v50, %v2505_v8 }
 0x1ab   :  { %v2511_v0 = vmul.f32 %v5982_v16, %v5866_v27  ;;  %v5988_v23 = vadd.f32 %v2486_v17, %v2229_v24  ;;  %v2522_v19 = vadd.f32 %v2521_v41, %v2510_v15 }
 0x1ac   :  { %v2517_v33 = vadd.f32 %v2516_v18, %v2506_v6 }
 0x1ad   :  { %v2512_v14 = vmul.f32 %v5988_v23, %v5874_v40  ;;  %v2523_v39 = vadd.f32 %v2522_v19, %v2511_v0 }
 0x1ae   :  { %2518 = vadd.xlane.f32.xlu0 %v2517_v33 }
 0x1af   :  { %v2524_v32 = vadd.f32 %v2523_v39, %v2512_v14 }
 0x1b1   :  { %2525 = vadd.xlane.f32.xlu1 %v2524_v32 }
 0x237   :  { %v2519_v53 = vpop.xlane.xlu0 %2518 }
 0x238   :  { %v5992_v21 = vmul.f32 0.001953125, %v2519_v53 }
 0x23a   :  { %v2526_v11 = vpop.xlane.xlu1 %2525  ;;  %v2529_v5 = vsub.f32 %v5932_v61, %v5992_v21  ;;  %v2530_v45 = vsub.f32 %v5939_v3, %v5992_v21  ;;  %v2531_v42 = vsub.f32 %v5950_v58, %v5992_v21  ;;  %v2532_v2 = vsub.f32 %v5961_v56, %v5992_v21 }
 0x23b   :  { %v6002_v25 = vmul.f32 0.001953125, %v2526_v11  ;;  %v2533_v38 = vsub.f32 %v5967_v47, %v5992_v21  ;;  %v2534_v51 = vsub.f32 %v5978_v12, %v5992_v21 }
 0x23c   :  { %v2541_v26 = vmul.f32 %v2529_v5, %v5856_v43  ;;  %v2542_v37 = vmul.f32 %v2530_v45, %v5860_v31  ;;  %v2543_v34 = vmul.f32 %v2531_v42, %v5862_v49  ;;  %v2544_v29 = vmul.f32 %v2532_v2, %v5864_v28 }
 0x23d   :  { %v2535_v63 = vsub.f32 %v5948_v22, %v6002_v25  ;;  %v2536_v20 = vsub.f32 %v5956_v54, %v6002_v25  ;;  %v2537_v36 = vsub.f32 %v5965_v59, %v6002_v25  ;;  %v2538_v57 = vsub.f32 %v5976_v9, %v6002_v25 }
 0x23e   :  { %v2553_v30 = vmul.f32 %v2541_v26, %v2541_v26  ;;  %v2554_v35 = vmul.f32 %v2542_v37, %v2542_v37  ;;  %v2545_v7 = vmul.f32 %v2533_v38, %v5866_v27  ;;  %v2555_v4 = vmul.f32 %v2543_v34, %v2543_v34 }
 0x23f   :  { %v2547_v48 = vmul.f32 %v2535_v63, %v5856_v43  ;;  %v2539_v60 = vsub.f32 %v5982_v16, %v6002_v25  ;;  %v2548_v44 = vmul.f32 %v2536_v20, %v5860_v31  ;;  %v2549_v10 = vmul.f32 %v2537_v36, %v5862_v49  ;;  %v2581_v63 = vld [vmem:[%s6816_s3] sm:$0xff] }
 0x240   :  { %v2565_v1 = vadd.f32 %v2554_v35, %v2553_v30  ;;  %v2546_v52 = vmul.f32 %v2534_v51, %v5874_v40  ;;  %v2556_v55 = vmul.f32 %v2544_v29, %v2544_v29  ;;  %v2540_v8 = vsub.f32 %v5988_v23, %v6002_v25  ;;  %v2582_v29 = vld [vmem:[%s6816_s3 + $0x8] sm:$0xff] }
 0x241   :  { %v2559_v62 = vmul.f32 %v2547_v48, %v2547_v48  ;;  %v2550_v13 = vmul.f32 %v2538_v57, %v5864_v28  ;;  %v2560_v50 = vmul.f32 %v2548_v44, %v2548_v44  ;;  %v2557_v24 = vmul.f32 %v2545_v7, %v2545_v7  ;;  %v2589_v57 = vld [vmem:[%s6817_s4] sm:$0xff]  ;;  %v2590_v7 = vld [vmem:[%s6817_s4 + $0x8] sm:$0xff] }
 0x242   :  { %v2566_v46 = vadd.f32 %v2565_v1, %v2555_v4  ;;  %v2551_v15 = vmul.f32 %v2539_v60, %v5866_v27  ;;  %v2561_v17 = vmul.f32 %v2549_v10, %v2549_v10  ;;  %v2558_v18 = vmul.f32 %v2546_v52, %v2546_v52 }
 0x243   :  { %v2572_v6 = vadd.f32 %v2560_v50, %v2559_v62  ;;  %v2552_v19 = vmul.f32 %v2540_v8, %v5874_v40  ;;  %v2562_v33 = vmul.f32 %v2550_v13, %v2550_v13 }
 0x244   :  { %v2567_v41 = vadd.f32 %v2566_v46, %v2556_v55  ;;  %v2563_v32 = vmul.f32 %v2551_v15, %v2551_v15 }
 0x245   :  { %v2573_v14 = vadd.f32 %v2572_v6, %v2561_v17  ;;  %v2564_v11 = vmul.f32 %v2552_v19, %v2552_v19 }
 0x246   :  { %v2568_v0 = vadd.f32 %v2567_v41, %v2557_v24 }
 0x247   :  { %v2574_v53 = vadd.f32 %v2573_v14, %v2562_v33 }
 0x248   :  { %v2569_v39 = vadd.f32 %v2568_v0, %v2558_v18 }
 0x249   :  { %v2575_v5 = vadd.f32 %v2574_v53, %v2563_v32 }
 0x24a   :  { %2570 = vadd.xlane.f32.xlu1 %v2569_v39 }
 0x24b   :  { %v2576_v45 = vadd.f32 %v2575_v5, %v2564_v11 }
 0x24d   :  { %2577 = vadd.xlane.f32.xlu0 %v2576_v45 }
 0x2d3   :  { %v2571_v42 = vpop.xlane.xlu1 %2570 }
 0x2d4   :  { %v2579_v2 = vmul.f32 0.001953125, %v2571_v42 }
 0x2d6   :  { %v2583_v38 = vadd.f32 1e-05, %v2579_v2  ;;  %v2578_v26 = vpop.xlane.xlu0 %2577 }
 0x2d7   :  { %v2580_v37 = vmul.f32 0.001953125, %v2578_v26 }
 0x2d8   :  { %5220 = vrsqrt.f32 %v2583_v38 }
 0x2d9   :  { %v2584_v34 = vadd.f32 1e-05, %v2580_v37 }
 0x2db   :  { %5222 = vrsqrt.f32 %v2584_v34 }
 0x2e5   :  { %v5221_v20 = vpop.eup %5220 }
 0x2e6   :  { %v2587_v51 = vmul.f32 %v5221_v20, %v2581_v63 }
 0x2e8   :  { %2597 = vperm.xlu1 %5219, %v2587_v51   ;;  %v5223_v30 = vpop.eup %5222  ;;  %v2591_v36 = vmul.f32 %v2587_v51, %v5992_v21 }
 0x2e9   :  { %v2588_v35 = vmul.f32 %v5223_v30, %v2582_v29 }
 0x2ea   :  { %v2593_v1 = vsub.f32 %v2589_v57, %v2591_v36 }
 0x2eb   :  { %2602 = vperm.xlu0 %5218, %v2588_v35   ;;  %v2592_v4 = vmul.f32 %v2588_v35, %v6002_v25 }
 0x2ed   :  { %v2594_v48 = vsub.f32 %v2590_v7, %v2592_v4 }
 0x2ef   :  { %2619 = vperm.xlu0 %5218, %v2593_v1   ;;  %2624 = vperm.xlu1 %5219, %v2594_v48  }
 0x363   :  { %v2598_v60 = vpop.permute.xlu1 %2597 }
 0x364   :  { %v2605_v21 = vmul.f32 %v2598_v60, %v5932_v61  ;;  %v2606_v10 = vmul.f32 %v2598_v60, %v5939_v3  ;;  %v2608_v52 = vmul.f32 %v2598_v60, %v5961_v56  ;;  %v2610_v55 = vmul.f32 %v2598_v60, %v5978_v12 }
 0x365   :  { %v2607_v25 = vmul.f32 %v2598_v60, %v5950_v58  ;;  %v2609_v56 = vmul.f32 %v2598_v60, %v5967_v47 }
 0x366   :  { %v6046_v44 = vpop.permute.xlu0 %2602 }
 0x367   :  { %v2611_v39 = vmul.f32 %v6046_v44, %v5948_v22  ;;  %v2616_v53 = vmul.f32 %v6046_v44, %v5988_v23  ;;  %v2613_v22 = vmul.f32 %v6046_v44, %v5965_v59  ;;  %v2615_v2 = vmul.f32 %v6046_v44, %v5982_v16 }
 0x368   :  { %v2614_v34 = vmul.f32 %v6046_v44, %v5976_v9 }
 0x36a   :  { %v2620_v46 = vpop.permute.xlu0 %2619  ;;  %v2625_v14 = vpop.permute.xlu1 %2624 }
 0x36b   :  { %v2627_v62 = vadd.f32 %v2620_v46, %v2605_v21  ;;  %v2628_v8 = vadd.f32 %v2620_v46, %v2606_v10  ;;  %v2630_v13 = vadd.f32 %v2620_v46, %v2608_v52  ;;  %v2632_v50 = vadd.f32 %v2620_v46, %v2610_v55 }
 0x36c   :  { %v2629_v15 = vadd.f32 %v2620_v46, %v2607_v25  ;;  %v2631_v58 = vadd.f32 %v2620_v46, %v2609_v56  ;;  %v2633_v32 = vadd.f32 %v2625_v14, %v2611_v39  ;;  %v2638_v11 = vadd.f32 %v2625_v14, %v2616_v53 }
 0x36d   :  { %v2639_v24 = vmax.f32 %v2627_v62, 0.0  ;;  %v2640_v41 = vmax.f32 %v2628_v8, 0.0  ;;  %v2642_v17 = vmax.f32 %v2630_v13, 0.0  ;;  %v2644_v6 = vmax.f32 %v2632_v50, 0.0 }
 0x36e   :  { %v2641_v12 = vmax.f32 %v2629_v15, 0.0  ;;  %v2643_v47 = vmax.f32 %v2631_v58, 0.0  ;;  %v2645_v5 = vmax.f32 %v2633_v32, 0.0  ;;  %v2635_v45 = vadd.f32 %v2625_v14, %v2613_v22 }
 0x36f   :  { %v6054_v61 = vmul.f32 %v2639_v24, %v5856_v43  ;;  %v6057_v3 = vmul.f32 %v2640_v41, %v5860_v31  ;;  %v6065_v18 = vmul.f32 %v2642_v17, %v5864_v28  ;;  %v6068_v0 = vmul.f32 %v2644_v6, %v5874_v40 }
 0x370   :  { %v6075_v19 = vmul.f32 %v2641_v12, %v5862_v49  ;;  %v6082_v33 = vmul.f32 %v2643_v47, %v5866_v27  ;;  %v2650_v42 = vmax.f32 %v2638_v11, 0.0  ;;  %v6151_v23 = vmul.f32 %v2645_v5, %v5856_v43 }
 0x371   :  { %2670 = vrot.lane.b32.xlu0 %v6054_v61, %s5249_s9  ;;  %2674 = vrot.lane.b32.xlu1 %v6057_v3, %s5249_s9  ;;  %v2637_v59 = vadd.f32 %v2625_v14, %v2615_v2  ;;  %v2647_v38 = vmax.f32 %v2635_v45, 0.0  ;;  %v2636_v63 = vadd.f32 %v2625_v14, %v2614_v34 }
 0x372   :  { %v6160_v26 = vmul.f32 %v2650_v42, %v5874_v40  ;;  %v2612_v40 = vmul.f32 %v6046_v44, %v5956_v54 }
 0x373   :  { %v2649_v43 = vmax.f32 %v2637_v59, 0.0  ;;  %v6167_v16 = vmul.f32 %v2647_v38, %v5862_v49  ;;  %v2648_v20 = vmax.f32 %v2636_v63, 0.0 }
 0x375   :  { %2690 = vrot.lane.b32.xlu0 %v6068_v0, %s5249_s9  ;;  %2682 = vrot.lane.b32.xlu1 %v6065_v18, %s5249_s9  ;;  %v6174_v37 = vmul.f32 %v2649_v43, %v5866_v27  ;;  %v2634_v27 = vadd.f32 %v2625_v14, %v2612_v40 }
 0x377   :  { %v2646_v49 = vmax.f32 %v2634_v27, 0.0 }
 0x379   :  { %2678 = vrot.lane.b32.xlu0 %v6075_v19, %s5249_s9  ;;  %2935 = vrot.lane.b32.xlu1 %v6057_v3, %s5250_s18  ;;  %v6199_v54 = vmul.f32 %v2646_v49, %v5860_v31  ;;  %v6216_v31 = vmul.f32 %v2648_v20, %v5864_v28 }
 0x37d   :  { %2686 = vrot.lane.b32.xlu0 %v6082_v33, %s5249_s9  ;;  %2943 = vrot.lane.b32.xlu1 %v6065_v18, %s5250_s18 }
 0x381   :  { %2931 = vrot.lane.b32.xlu0 %v6054_v61, %s5250_s18  ;;  %2947 = vrot.lane.b32.xlu1 %v6082_v33, %s5250_s18 }
 0x385   :  { %2939 = vrot.lane.b32.xlu0 %v6075_v19, %s5250_s18  ;;  %3195 = vrot.lane.b32.xlu1 %v6057_v3, %s5251_s0 }
 0x389   :  { %2951 = vrot.lane.b32.xlu0 %v6068_v0, %s5250_s18  ;;  %3203 = vrot.lane.b32.xlu1 %v6065_v18, %s5251_s0 }
 0x38d   :  { %3191 = vrot.lane.b32.xlu0 %v6054_v61, %s5251_s0  ;;  %3455 = vrot.lane.b32.xlu1 %v6057_v3, %s5252_s19 }
 0x391   :  { %3211 = vrot.lane.b32.xlu0 %v6068_v0, %s5251_s0  ;;  %3463 = vrot.lane.b32.xlu1 %v6065_v18, %s5252_s19 }
 0x395   :  { %3199 = vrot.lane.b32.xlu0 %v6075_v19, %s5251_s0  ;;  %3943 = vrot.lane.b32.xlu1 %v6075_v19, %s5253_s20 }
 0x399   :  { %3207 = vrot.lane.b32.xlu0 %v6082_v33, %s5251_s0  ;;  %3951 = vrot.lane.b32.xlu1 %v6082_v33, %s5253_s20 }
 0x39d   :  { %3451 = vrot.lane.b32.xlu0 %v6054_v61, %s5252_s19  ;;  %3955 = vrot.lane.b32.xlu1 %v6068_v0, %s5253_s20 }
 0x3a1   :  { %3459 = vrot.lane.b32.xlu0 %v6075_v19, %s5252_s19  ;;  %4203 = vrot.lane.b32.xlu1 %v6075_v19, %s5254_s21 }
 0x3a5   :  { %3471 = vrot.lane.b32.xlu0 %v6068_v0, %s5252_s19  ;;  %4211 = vrot.lane.b32.xlu1 %v6082_v33, %s5254_s21 }
 0x3a9   :  { %3467 = vrot.lane.b32.xlu0 %v6082_v33, %s5252_s19  ;;  %4463 = vrot.lane.b32.xlu1 %v6075_v19, %s5256_s22 }
 0x3ad   :  { %3939 = vrot.lane.b32.xlu0 %v6057_v3, %s5253_s20  ;;  %4471 = vrot.lane.b32.xlu1 %v6082_v33, %s5256_s22 }
 0x3b1   :  { %3947 = vrot.lane.b32.xlu0 %v6065_v18, %s5253_s20  ;;  %4475 = vrot.lane.b32.xlu1 %v6068_v0, %s5256_s22 }
 0x3b5   :  { %3935 = vrot.lane.b32.xlu0 %v6054_v61, %s5253_s20  ;;  %4723 = vrot.lane.b32.xlu1 %v6075_v19, %s5257_s23 }
 0x3b9   :  { %4199 = vrot.lane.b32.xlu0 %v6057_v3, %s5254_s21  ;;  %2672 = vrot.lane.b32.xlu1 %v6151_v23, %s5249_s9 }
 0x3bd   :  { %4195 = vrot.lane.b32.xlu0 %v6054_v61, %s5254_s21  ;;  %2692 = vrot.lane.b32.xlu1 %v6160_v26, %s5249_s9 }
 0x3c1   :  { %4207 = vrot.lane.b32.xlu0 %v6065_v18, %s5254_s21  ;;  %2680 = vrot.lane.b32.xlu1 %v6167_v16, %s5249_s9 }
 0x3c5   :  { %4215 = vrot.lane.b32.xlu0 %v6068_v0, %s5254_s21  ;;  %2688 = vrot.lane.b32.xlu1 %v6174_v37, %s5249_s9 }
 0x3c9   :  { %4459 = vrot.lane.b32.xlu0 %v6057_v3, %s5256_s22  ;;  %2933 = vrot.lane.b32.xlu1 %v6151_v23, %s5250_s18 }
 0x3cd   :  { %4467 = vrot.lane.b32.xlu0 %v6065_v18, %s5256_s22  ;;  %2941 = vrot.lane.b32.xlu1 %v6167_v16, %s5250_s18 }
 0x3d1   :  { %4455 = vrot.lane.b32.xlu0 %v6054_v61, %s5256_s22  ;;  %2953 = vrot.lane.b32.xlu1 %v6160_v26, %s5250_s18 }
 0x3d5   :  { %4719 = vrot.lane.b32.xlu0 %v6057_v3, %s5257_s23  ;;  %2949 = vrot.lane.b32.xlu1 %v6174_v37, %s5250_s18 }
 0x3d9   :  { %4715 = vrot.lane.b32.xlu0 %v6054_v61, %s5257_s23  ;;  %3197 = vrot.lane.b32.xlu1 %v6199_v54, %s5251_s0 }
 0x3dd   :  { %4727 = vrot.lane.b32.xlu0 %v6065_v18, %s5257_s23  ;;  %3201 = vrot.lane.b32.xlu1 %v6167_v16, %s5251_s0 }
 0x3e1   :  { %2676 = vrot.lane.b32.xlu0 %v6199_v54, %s5249_s9  ;;  %3209 = vrot.lane.b32.xlu1 %v6174_v37, %s5251_s0 }
 0x3e3   :  { %v2671_v9 = vpop.permute.xlu0 %2670  ;;  %v2675_v51 = vpop.permute.xlu1 %2674 }
 0x3e4   :  { %v6220_v30 = vsel %vm95_vm0, %v2671_v9, %v2675_v51 }
 0x3e5   :  { %2684 = vrot.lane.b32.xlu0 %v6216_v31, %s5249_s9  ;;  %3453 = vrot.lane.b32.xlu1 %v6151_v23, %s5252_s19 }
 0x3e7   :  { %v2691_v35 = vpop.permute.xlu0 %2690  ;;  %v2683_v36 = vpop.permute.xlu1 %2682 }
 0x3e8   :  { %v6228_v57 = vsel %vm95_vm0, %v2691_v35, %v2671_v9 }
 0x3e9   :  { %2937 = vrot.lane.b32.xlu0 %v6199_v54, %s5250_s18  ;;  %3461 = vrot.lane.b32.xlu1 %v6167_v16, %s5252_s19 }
 0x3eb   :  { %v2679_v28 = vpop.permute.xlu0 %2678  ;;  %v2936_v7 = vpop.permute.xlu1 %2935 }
 0x3ec   :  { %v6236_v4 = vsel %vm95_vm0, %v2675_v51, %v2679_v28  ;;  %v6240_v1 = vsel %vm95_vm0, %v2679_v28, %v2683_v36 }
 0x3ed   :  { %2945 = vrot.lane.b32.xlu0 %v6216_v31, %s5250_s18  ;;  %3473 = vrot.lane.b32.xlu1 %v6160_v26, %s5252_s19 }
 0x3ef   :  { %v2687_v48 = vpop.permute.xlu0 %2686  ;;  %v2944_v60 = vpop.permute.xlu1 %2943 }
 0x3f0   :  { %v6248_v44 = vsel %vm95_vm0, %v2683_v36, %v2687_v48  ;;  %v6252_v21 = vsel %vm95_vm0, %v2687_v48, %v2691_v35 }
 0x3f1   :  { %3193 = vrot.lane.b32.xlu0 %v6151_v23, %s5251_s0  ;;  %3469 = vrot.lane.b32.xlu1 %v6174_v37, %s5252_s19 }
 0x3f3   :  { %v2932_v10 = vpop.permute.xlu0 %2931  ;;  %v2948_v52 = vpop.permute.xlu1 %2947 }
 0x3f4   :  { %v6260_v55 = vsel %vm367_vm2, %v2944_v60, %v2948_v52  ;;  %v6264_v46 = vsel %vm367_vm2, %v2932_v10, %v2936_v7 }
 0x3f5   :  { %3213 = vrot.lane.b32.xlu0 %v6160_v26, %s5251_s0  ;;  %3941 = vrot.lane.b32.xlu1 %v6199_v54, %s5253_s20 }
 0x3f7   :  { %v2940_v62 = vpop.permute.xlu0 %2939  ;;  %v3196_v8 = vpop.permute.xlu1 %3195 }
 0x3f8   :  { %v6272_v13 = vsel %vm367_vm2, %v2936_v7, %v2940_v62  ;;  %v6276_v25 = vsel %vm367_vm2, %v2940_v62, %v2944_v60 }
 0x3f9   :  { %3205 = vrot.lane.b32.xlu0 %v6216_v31, %s5251_s0  ;;  %3949 = vrot.lane.b32.xlu1 %v6216_v31, %s5253_s20 }
 0x3fb   :  { %v2952_v50 = vpop.permute.xlu0 %2951  ;;  %v3204_v24 = vpop.permute.xlu1 %3203 }
 0x3fc   :  { %v6284_v41 = vsel %vm367_vm2, %v2952_v50, %v2932_v10  ;;  %v6288_v15 = vsel %vm367_vm2, %v2948_v52, %v2952_v50 }
 0x3fd   :  { %3457 = vrot.lane.b32.xlu0 %v6199_v54, %s5252_s19  ;;  %3937 = vrot.lane.b32.xlu1 %v6151_v23, %s5253_s20 }
 0x3ff   :  { %v3192_v17 = vpop.permute.xlu0 %3191  ;;  %v3456_v6 = vpop.permute.xlu1 %3455 }
 0x400   :  { %v6296_v56 = vsel %vm638_vm3, %v3192_v17, %v3196_v8 }
 0x401   :  { %3465 = vrot.lane.b32.xlu0 %v6216_v31, %s5252_s19  ;;  %3957 = vrot.lane.b32.xlu1 %v6160_v26, %s5253_s20 }
 0x403   :  { %v3212_v58 = vpop.permute.xlu0 %3211  ;;  %v3464_v12 = vpop.permute.xlu1 %3463 }
 0x404   :  { %v6304_v47 = vsel %vm638_vm3, %v3212_v58, %v3192_v17 }
 0x405   :  { %3945 = vrot.lane.b32.xlu0 %v6167_v16, %s5253_s20  ;;  %4205 = vrot.lane.b32.xlu1 %v6167_v16, %s5254_s21 }
 0x407   :  { %v3200_v14 = vpop.permute.xlu0 %3199  ;;  %v3944_v39 = vpop.permute.xlu1 %3943 }
 0x408   :  { %v6312_v32 = vsel %vm638_vm3, %v3196_v8, %v3200_v14  ;;  %v6316_v53 = vsel %vm638_vm3, %v3200_v14, %v3204_v24 }
 0x409   :  { %3953 = vrot.lane.b32.xlu0 %v6174_v37, %s5253_s20  ;;  %4209 = vrot.lane.b32.xlu1 %v6216_v31, %s5254_s21 }
 0x40b   :  { %v3208_v11 = vpop.permute.xlu0 %3207  ;;  %v3952_v5 = vpop.permute.xlu1 %3951 }
 0x40c   :  { %v6324_v22 = vsel %vm638_vm3, %v3204_v24, %v3208_v11  ;;  %v6328_v45 = vsel %vm638_vm3, %v3208_v11, %v3212_v58 }
 0x40d   :  { %4201 = vrot.lane.b32.xlu0 %v6199_v54, %s5254_s21  ;;  %4217 = vrot.lane.b32.xlu1 %v6160_v26, %s5254_s21 }
 0x40f   :  { %v3452_v42 = vpop.permute.xlu0 %3451  ;;  %v3956_v2 = vpop.permute.xlu1 %3955 }
 0x410   :  { %v6336_v59 = vsel %vm1432_vm5, %v3952_v5, %v3956_v2  ;;  %v6340_v38 = vsel %vm909_vm4, %v3452_v42, %v3456_v6 }
 0x411   :  { %4197 = vrot.lane.b32.xlu0 %v6151_v23, %s5254_s21  ;;  %4461 = vrot.lane.b32.xlu1 %v6199_v54, %s5256_s22 }
 0x413   :  { %v3460_v43 = vpop.permute.xlu0 %3459  ;;  %v4204_v40 = vpop.permute.xlu1 %4203 }
 0x414   :  { %v6348_v27 = vsel %vm909_vm4, %v3456_v6, %v3460_v43  ;;  %v6352_v49 = vsel %vm909_vm4, %v3460_v43, %v3464_v12 }
 0x415   :  { %4213 = vrot.lane.b32.xlu0 %v6174_v37, %s5254_s21  ;;  %4469 = vrot.lane.b32.xlu1 %v6216_v31, %s5256_s22 }
 0x417   :  { %v3472_v34 = vpop.permute.xlu0 %3471  ;;  %v4212_v63 = vpop.permute.xlu1 %4211 }
 0x418   :  { %v6360_v20 = vsel %vm909_vm4, %v3472_v34, %v3452_v42 }
 0x419   :  { %4465 = vrot.lane.b32.xlu0 %v6167_v16, %s5256_s22  ;;  %4457 = vrot.lane.b32.xlu1 %v6151_v23, %s5256_s22 }
 0x41b   :  { %v3468_v9 = vpop.permute.xlu0 %3467  ;;  %v4464_v51 = vpop.permute.xlu1 %4463 }
 0x41c   :  { %v6368_v35 = vsel %vm909_vm4, %v3464_v12, %v3468_v9  ;;  %v6372_v36 = vsel %vm909_vm4, %v3468_v9, %v3472_v34 }
 0x41d   :  { %4473 = vrot.lane.b32.xlu0 %v6174_v37, %s5256_s22  ;;  %4477 = vrot.lane.b32.xlu1 %v6160_v26, %s5256_s22 }
 0x41f   :  { %v3940_v28 = vpop.permute.xlu0 %3939  ;;  %v4472_v7 = vpop.permute.xlu1 %4471 }
 0x420   :  { %v6380_v48 = vsel %vm1432_vm5, %v3940_v28, %v3944_v39 }
 0x421   :  { %4721 = vrot.lane.b32.xlu0 %v6199_v54, %s5257_s23  ;;  %4725 = vrot.lane.b32.xlu1 %v6167_v16, %s5257_s23 }
 0x423   :  { %v3948_v60 = vpop.permute.xlu0 %3947  ;;  %v4476_v10 = vpop.permute.xlu1 %4475 }
 0x424   :  { %v6388_v52 = vsel %vm1432_vm5, %v3944_v39, %v3948_v60  ;;  %v6392_v62 = vsel %vm1974_vm7, %v4472_v7, %v4476_v10  ;;  %v6396_v8 = vsel %vm1432_vm5, %v3948_v60, %v3952_v5  ;;  %v2663_v39 = vld [vmem:[%s6818_s6] sm:$0xff] }
 0x425   :  { %6876 = vst [vmem:[#allocation3_spill] sm:$0xff] %v6392_v62  ;;  %4717 = vrot.lane.b32.xlu0 %v6151_v23, %s5257_s23  ;;  %4729 = vrot.lane.b32.xlu1 %v6216_v31, %s5257_s23 }
 0x427   :  { %v3936_v50 = vpop.permute.xlu0 %3935  ;;  %v6402_v24 = vpop.permute.xlu1 %4723 }
 0x428   :  { %6877 = vst [vmem:[#allocation4_spill] sm:$0xff] %v6402_v24  ;;  %v6406_v17 = vsel %vm1432_vm5, %v3936_v50, %v3940_v28  ;;  %v6410_v6 = vsel %vm1432_vm5, %v3956_v2, %v3936_v50 }
 0x429   :  { %4733 = vrot.lane.b32.xlu0 %v6174_v37, %s5257_s23  ;;  %4737 = vrot.lane.b32.xlu1 %v6160_v26, %s5257_s23 }
 0x42b   :  { %v4200_v58 = vpop.permute.xlu0 %4199  ;;  %v2673_v12 = vpop.permute.xlu1 %2672 }
 0x42c   :  { %v6418_v14 = vsel %vm1703_vm6, %v4200_v58, %v4204_v40 }
 0x42d   :  { %4735 = vrot.lane.b32.xlu0 %v6068_v0, %s5257_s23  ;;  %4731 = vrot.lane.b32.xlu1 %v6082_v33, %s5257_s23 }
 0x42f   :  { %v4196_v11 = vpop.permute.xlu0 %4195  ;;  %v2693_v5 = vpop.permute.xlu1 %2692 }
 0x430   :  { %v6429_v42 = vsel %vm1703_vm6, %v4196_v11, %v4200_v58 }
 0x431   :  { %6878 = vst [vmem:[#allocation5_spill] sm:$0xff] %v6429_v42  ;;  %2666 = vperm.xlu1 %5219, %v2663_v39  }
 0x433   :  { %v4208_v2 = vpop.permute.xlu0 %4207  ;;  %v2681_v43 = vpop.permute.xlu1 %2680 }
 0x434   :  { %v6433_v34 = vsel %vm1703_vm6, %v4204_v40, %v4208_v2  ;;  %v6437_v9 = vsel %vm1703_vm6, %v4208_v2, %v4212_v63 }
 0x435   :  { %6879 = vst [vmem:[#allocation6_spill] sm:$0xff] %v6433_v34  ;;  %6880 = vst [vmem:[#allocation7_spill] sm:$0xff] %v6437_v9 }
 0x437   :  { %v4216_v28 = vpop.permute.xlu0 %4215  ;;  %v2689_v60 = vpop.permute.xlu1 %2688 }
 0x438   :  { %v6441_v50 = vsel %vm1703_vm6, %v4212_v63, %v4216_v28  ;;  %v2695_v58 = vsel %vm95_vm0, %v2689_v60, %v2693_v5  ;;  %v6447_v39 = vsel %vm1703_vm6, %v4216_v28, %v4196_v11 }
 0x439   :  { %6881 = vst [vmem:[#allocation8_spill] sm:$0xff] %v6441_v50  ;;  %6882 = vst [vmem:[#allocation17_spill] sm:$0xff] %v6447_v39  ;;  %2880 = vmatprep.subr.mxu0 %v2695_v58 }
 0x43b   :  { %v4460_v40 = vpop.permute.xlu0 %4459  ;;  %v2934_v62 = vpop.permute.xlu1 %2933 }
 0x43c   :  { %v6451_v2 = vsel %vm1974_vm7, %v4460_v40, %v4464_v51 }
 0x43d   :  { %6883 = vst [vmem:[#allocation9_spill] sm:$0xff] %v6451_v2 }
 0x43f   :  { %v4468_v34 = vpop.permute.xlu0 %4467  ;;  %v2942_v9 = vpop.permute.xlu1 %2941 }
 0x440   :  { %v6455_v63 = vsel %vm1974_vm7, %v4464_v51, %v4468_v34  ;;  %v6459_v50 = vsel %vm1974_vm7, %v4468_v34, %v4472_v7 }
 0x441   :  { %6884 = vst [vmem:[#allocation10_spill] sm:$0xff] %v6455_v63  ;;  %6885 = vst [vmem:[#allocation11_spill] sm:$0xff] %v6459_v50 }
 0x443   :  { %v4456_v42 = vpop.permute.xlu0 %4455  ;;  %v2954_v11 = vpop.permute.xlu1 %2953 }
 0x444   :  { %v6463_v28 = vsel %vm1974_vm7, %v4456_v42, %v4460_v40  ;;  %v6467_v58 = vsel %vm1974_vm7, %v4476_v10, %v4456_v42 }
 0x445   :  { %6886 = vst [vmem:[#allocation12_spill] sm:$0xff] %v6467_v58  ;;  %v2705_v58 = vsel %vm95_vm0, %v2693_v5, %v2673_v12 }
 0x447   :  { %v6469_v2 = vpop.permute.xlu0 %4719  ;;  %v2950_v39 = vpop.permute.xlu1 %2949 }
 0x448   :  { %v6475_v51 = vsel %vm2245_vm8, %v6469_v2, %v6402_v24  ;;  %v2669_v24 = vld [vmem:[%s6819_s5] sm:$0xff] }
 0x449   :  { %6887 = vst [vmem:[#allocation18_spill] sm:$0xff] %v6475_v51 }
 0x44b   :  { %v6477_v7 = vpop.permute.xlu0 %4715  ;;  %v6479_v34 = vpop.permute.xlu1 %3197 }
 0x44c   :  { %6888 = vst [vmem:[#allocation19_spill] sm:$0xff] %v6477_v7 }
 0x44f   :  { %v6481_v63 = vpop.permute.xlu0 %4727  ;;  %v6483_v40 = vpop.permute.xlu1 %3201 }
 0x450   :  { %6889 = vst [vmem:[#allocation13_spill] sm:$0xff] %v6481_v63 }
 0x453   :  { %v2677_v50 = vpop.permute.xlu0 %2676  ;;  %v6485_v10 = vpop.permute.xlu1 %3209 }
 0x454   :  { %v2703_v42 = vsel %vm95_vm0, %v2673_v12, %v2677_v50  ;;  %v2701_v5 = vsel %vm95_vm0, %v2677_v50, %v2681_v43 }
 0x455   :  { %2738 = vmatprep.subr.mxu1 %v2703_v42 }
 0x456   :  { %2739 = vmatpush1.msra.mxu1 %v2705_v58 }
 0x457   :  { %v2685_v51 = vpop.permute.xlu0 %2684  ;;  %2740 = vmatprep.subr.mxu1 %v6220_v30  ;;  %v6495_v63 = vpop.permute.xlu1 %3453 }
 0x458   :  { %v2697_v7 = vsel %vm95_vm0, %v2685_v51, %v2689_v60  ;;  %2741 = vmatpush1.msra.mxu1 %v6228_v57  ;;  %v2699_v12 = vsel %vm95_vm0, %v2681_v43, %v2685_v51  ;;  %v6890_v43 = vmov 0.0   ;;  %v2966_v60 = vsel %vm367_vm2, %v2954_v11, %v2934_v62 }
 0x459   :  { %5173 = vmatmul.mubr.msk.f32.vlgmr.msra.gmra.mxu1 %vm2706_vm9, %v2669_v24  ;;  %2809 = vmatprep.subr.mxu1 %v2699_v12 }
 0x45a   :  { %2881 = vmatpush1.msra.mxu0 %v2697_v7  ;;  %2810 = vmatpush1.msra.mxu1 %v2701_v5 }
 0x45b   :  { %2882 = vmatprep.subr.mxu0 %v6252_v21  ;;  %v2938_v30 = vpop.permute.xlu0 %2937  ;;  %2811 = vmatprep.subr.mxu1 %v6240_v1  ;;  %v6507_v58 = vpop.permute.xlu1 %3461 }
 0x45c   :  { %2883 = vmatpush1.msra.mxu0 %v6248_v44  ;;  %2812 = vmatpush1.msra.mxu1 %v6236_v4  ;;  %v2964_v57 = vsel %vm367_vm2, %v2934_v62, %v2938_v30  ;;  %v5176_v4 = vld [vmem:[%s6819_s5 + $0x8] sm:$0xff]  ;;  %v2962_v50 = vsel %vm367_vm2, %v2938_v30, %v2942_v9 }
 0x45d   :  { %2845 = vmatprep.mubr.f32.mxu1 %v6890_v43  ;;  %5175 = vmatmul.mubr.msk.f32.vlgmr.msra.gmra.mxu0 %vm2706_vm9, %v2669_v24 }
 0x45e   :  { %5174 = vmatmul.mubr.msk.f32.vlgmr.msra.gmra.mxu1 %vm2706_vm9, %v2669_v24  ;;  %2998 = vmatprep.subr.mxu1 %v2964_v57  ;;  %v2956_v24 = vsel %vm367_vm2, %v2950_v39, %v2954_v11 }
 0x45f   :  { %2999 = vmatpush1.msra.mxu1 %v2966_v60  ;;  %v2946_v1 = vpop.permute.xlu0 %2945  ;;  %v6518_v21 = vpop.permute.xlu1 %3473  ;;  %3034 = vmatprep.mubr.f32.mxu1 %v6890_v43 }
 0x460   :  { %v2958_v44 = vsel %vm367_vm2, %v2946_v1, %v2950_v39  ;;  %3000 = vmatprep.subr.mxu1 %v6264_v46  ;;  %v2960_v62 = vsel %vm367_vm2, %v2942_v9, %v2946_v1  ;;  %3105 = vmatprep.mubr.f32.mxu0 %v6890_v43  ;;  %v6891_v1 = vld [vmem:[#allocation5_spill] sm:$0xff] }
 0x461   :  { %3001 = vmatpush1.msra.mxu1 %v6284_v41  ;;  %3069 = vmatprep.subr.mxu0 %v2960_v62  ;;  %v6894_v62 = vld [vmem:[#allocation6_spill] sm:$0xff] }
 0x462   :  { %5177 = vmatmul.mubr.msk.f32.vlgmr.msra.gmra.mxu1 %vm2706_vm9, %v5176_v4  ;;  %3140 = vmatprep.subr.mxu1 %v2956_v24 }
 0x463   :  { %3070 = vmatpush1.msra.mxu0 %v2962_v50  ;;  %3141 = vmatpush1.msra.mxu1 %v2958_v44  ;;  %v3194_v46 = vpop.permute.xlu0 %3193  ;;  %v3470_v51 = vpop.permute.xlu1 %3469  ;;  %v6893_v44 = vld [vmem:[#allocation17_spill] sm:$0xff] }
 0x464   :  { %3071 = vmatprep.subr.mxu0 %v6276_v25  ;;  %3142 = vmatprep.subr.mxu1 %v6288_v15  ;;  %v3224_v41 = vsel %vm638_vm3, %v3194_v46, %v6479_v34  ;;  %v3476_v12 = vsel %vm909_vm4, %v3470_v51, %v6518_v21 }
 0x465   :  { %3072 = vmatpush1.msra.mxu0 %v6272_v13  ;;  %3143 = vmatpush1.msra.mxu1 %v6260_v55  ;;  %v5180_v55 = vld [vmem:[%s6819_s5 + $0x10] sm:$0xff] }
 0x466   :  { %3176 = vmatprep.mubr.f32.mxu1 %v6890_v43  ;;  %5178 = vmatmul.mubr.msk.f32.vlgmr.msra.gmra.mxu0 %vm2706_vm9, %v5176_v4 }
 0x467   :  { %5179 = vmatmul.mubr.msk.f32.vlgmr.msra.gmra.mxu1 %vm2706_vm9, %v5176_v4  ;;  %3258 = vmatprep.subr.mxu0 %v3224_v41  ;;  %v3214_v9 = vpop.permute.xlu0 %3213  ;;  %v6546_v39 = vpop.permute.xlu1 %3941  ;;  %v6892_v4 = vld [vmem:[#allocation7_spill] sm:$0xff] }
 0x468   :  { %v3226_v25 = vsel %vm638_vm3, %v3214_v9, %v3194_v46  ;;  %3294 = vmatprep.mubr.f32.mxu0 %v6890_v43  ;;  %3365 = vmatprep.mubr.f32.mxu1 %v6890_v43  ;;  %v3216_v11 = vsel %vm638_vm3, %v6485_v10, %v3214_v9  ;;  %v5200_v9 = vld [vmem:[%s6819_s5 + $0x38] sm:$0xff] }
 0x469   :  { %3259 = vmatpush1.msra.mxu0 %v3226_v25 }
 0x46a   :  { %3260 = vmatprep.subr.mxu0 %v6296_v56 }
 0x46b   :  { %v3206_v13 = vpop.permute.xlu0 %3205  ;;  %3261 = vmatpush1.msra.mxu0 %v6304_v47  ;;  %v6557_v15 = vpop.permute.xlu1 %3949  ;;  %v3222_v47 = vsel %vm638_vm3, %v6479_v34, %v6483_v40 }
 0x46c   :  { %v3218_v7 = vsel %vm638_vm3, %v3206_v13, %v6485_v10  ;;  %5181 = vmatmul.mubr.msk.f32.vlgmr.msra.gmra.mxu0 %vm2706_vm9, %v5180_v55  ;;  %3400 = vmatprep.subr.mxu0 %v3216_v11  ;;  %v3220_v56 = vsel %vm638_vm3, %v6483_v40, %v3206_v13 }
 0x46d   :  { %3329 = vmatprep.subr.mxu1 %v3220_v56  ;;  %3401 = vmatpush1.msra.mxu0 %v3218_v7  ;;  %v6897_v7 = vld [vmem:[#allocation11_spill] sm:$0xff] }
 0x46e   :  { %3330 = vmatpush1.msra.mxu1 %v3222_v47  ;;  %3402 = vmatprep.subr.mxu0 %v6328_v45 }
 0x46f   :  { %v3458_v42 = vpop.permute.xlu0 %3457  ;;  %3331 = vmatprep.subr.mxu1 %v6316_v53  ;;  %3403 = vmatpush1.msra.mxu0 %v6324_v22  ;;  %v6576_v10 = vpop.permute.xlu1 %3937  ;;  %v3486_v53 = vsel %vm909_vm4, %v6518_v21, %v6495_v63 }
 0x470   :  { %3436 = vmatprep.mubr.f32.mxu0 %v6890_v43  ;;  %3332 = vmatpush1.msra.mxu1 %v6312_v32  ;;  %v3484_v34 = vsel %vm909_vm4, %v6495_v63, %v3458_v42  ;;  %v5184_v32 = vld [vmem:[%s6819_s5 + $0x18] sm:$0xff]  ;;  %v3482_v5 = vsel %vm909_vm4, %v3458_v42, %v6507_v58  ;;  %v6898_v42 = vld [vmem:[#allocation12_spill] sm:$0xff] }
 0x471   :  { %5183 = vmatmul.mubr.msk.f32.vlgmr.msra.gmra.mxu0 %vm2706_vm9, %v5180_v55  ;;  %5182 = vmatmul.mubr.msk.f32.vlgmr.msra.gmra.mxu1 %vm2706_vm9, %v5180_v55 }
 0x472   :  { %3518 = vmatprep.subr.mxu1 %v3484_v34  ;;  %3554 = vmatprep.mubr.f32.mxu1 %v6890_v43 }
 0x473   :  { %3519 = vmatpush1.msra.mxu1 %v3486_v53  ;;  %v3466_v22 = vpop.permute.xlu0 %3465  ;;  %v6590_v45 = vpop.permute.xlu1 %3957  ;;  %3625 = vmatprep.mubr.f32.mxu0 %v6890_v43  ;;  %v6900_v53 = vld [vmem:[#allocation3_spill] sm:$0xff] }
 0x474   :  { %v3478_v40 = vsel %vm909_vm4, %v3466_v22, %v3470_v51  ;;  %3520 = vmatprep.subr.mxu1 %v6340_v38  ;;  %v3480_v63 = vsel %vm909_vm4, %v6507_v58, %v3466_v22  ;;  %v6895_v51 = vld [vmem:[#allocation8_spill] sm:$0xff] }
 0x475   :  { %3521 = vmatpush1.msra.mxu1 %v6360_v20  ;;  %3589 = vmatprep.subr.mxu0 %v3480_v63 }
 0x476   :  { %5185 = vmatmul.mubr.msk.f32.vlgmr.msra.gmra.mxu1 %vm2706_vm9, %v5184_v32  ;;  %3660 = vmatprep.subr.mxu1 %v3476_v12  ;;  %v5204_v12 = vld [vmem:[%s6819_s5 + $0x40] sm:$0xff] }
 0x477   :  { %3590 = vmatpush1.msra.mxu0 %v3482_v5  ;;  %3661 = vmatpush1.msra.mxu1 %v3478_v40  ;;  %v3946_v38 = vpop.permute.xlu0 %3945  ;;  %v6610_v30 = vpop.permute.xlu1 %4205  ;;  %v6901_v40 = vld [vmem:[#allocation19_spill] sm:$0xff] }
 0x478   :  { %3591 = vmatprep.subr.mxu0 %v6352_v49  ;;  %3662 = vmatprep.subr.mxu1 %v6372_v36  ;;  %v4747_v63 = vsel %vm2245_vm8, %v6901_v40, %v6469_v2  ;;  %v6903_v2 = vld [vmem:[#allocation13_spill] sm:$0xff] }
 0x479   :  { %3592 = vmatpush1.msra.mxu0 %v6348_v27  ;;  %3663 = vmatpush1.msra.mxu1 %v6368_v35  ;;  %v5188_v27 = vld [vmem:[%s6819_s5 + $0x20] sm:$0xff] }
 0x47a   :  { %3696 = vmatprep.mubr.f32.mxu1 %v6890_v43  ;;  %5186 = vmatmul.mubr.msk.f32.vlgmr.msra.gmra.mxu0 %vm2706_vm9, %v5184_v32 }
 0x47b   :  { %5187 = vmatmul.mubr.msk.f32.vlgmr.msra.gmra.mxu1 %vm2706_vm9, %v5184_v32  ;;  %3742 = vmatprep.subr.mxu0 %v6199_v54  ;;  %v3954_v20 = vpop.permute.xlu0 %3953  ;;  %v4210_v58 = vpop.permute.xlu1 %4209 }
 0x47c   :  { %3813 = vmatprep.subr.mxu1 %v6216_v31  ;;  %3743 = vmatpush1.msra.mxu0 %v6151_v23  ;;  %v5192_v23 = vld [vmem:[%s6819_s5 + $0x28] sm:$0xff]  ;;  %v3960_v49 = vsel %vm1432_vm5, %v3954_v20, %v6590_v45 }
 0x47d   :  { %3814 = vmatpush1.msra.mxu1 %v6167_v16  ;;  %3744 = vmatprep.subr.mxu0 %v6057_v3  ;;  %v3966_v3 = vsel %vm1432_vm5, %v6546_v39, %v3946_v38 }
 0x47e   :  { %3815 = vmatprep.subr.mxu1 %v6065_v18  ;;  %3745 = vmatpush1.msra.mxu0 %v6054_v61  ;;  %v3968_v61 = vsel %vm1432_vm5, %v6576_v10, %v6546_v39 }
 0x47f   :  { %3778 = vmatprep.mubr.f32.mxu0 %v6890_v43  ;;  %3816 = vmatpush1.msra.mxu1 %v6075_v19  ;;  %v4202_v54 = vpop.permute.xlu0 %4201  ;;  %v4218_v31 = vpop.permute.xlu1 %4217 }
 0x480   :  { %3849 = vmatprep.mubr.f32.mxu1 %v6890_v43  ;;  %5189 = vmatmul.mubr.msk.f32.vlgmr.msra.gmra.mxu0 %vm2706_vm9, %v5188_v27 }
 0x481   :  { %5190 = vmatmul.mubr.msk.f32.vlgmr.msra.gmra.mxu1 %vm2706_vm9, %v5188_v27  ;;  %3884 = vmatprep.subr.mxu0 %v6160_v26  ;;  %v3970_v26 = vsel %vm1432_vm5, %v6590_v45, %v6576_v10  ;;  %v6899_v10 = vld [vmem:[#allocation10_spill] sm:$0xff] }
 0x482   :  { %4002 = vmatprep.subr.mxu1 %v3966_v3  ;;  %3885 = vmatpush1.msra.mxu0 %v6174_v37 }
 0x483   :  { %4003 = vmatpush1.msra.mxu1 %v3968_v61  ;;  %3886 = vmatprep.subr.mxu0 %v6068_v0  ;;  %v4198_v18 = vpop.permute.xlu0 %4197  ;;  %v4462_v19 = vpop.permute.xlu1 %4461  ;;  %v3962_v0 = vsel %vm1432_vm5, %v6557_v15, %v3954_v20 }
 0x484   :  { %4004 = vmatprep.subr.mxu1 %v6380_v48  ;;  %3887 = vmatpush1.msra.mxu0 %v6082_v33  ;;  %v3964_v33 = vsel %vm1432_vm5, %v3946_v38, %v6557_v15  ;;  %v4228_v35 = vsel %vm1703_vm6, %v4198_v18, %v4202_v54  ;;  %v4230_v21 = vsel %vm1703_vm6, %v4218_v31, %v4198_v18  ;;  %v6896_v15 = vld [vmem:[#allocation9_spill] sm:$0xff] }
 0x485   :  { %3920 = vmatprep.mubr.f32.mxu0 %v6890_v43  ;;  %4005 = vmatpush1.msra.mxu1 %v6406_v17  ;;  %v4224_v17 = vsel %vm1703_vm6, %v6610_v30, %v4210_v58 }
 0x486   :  { %4038 = vmatprep.mubr.f32.mxu1 %v6890_v43  ;;  %5191 = vmatmul.mubr.msk.f32.vlgmr.msra.gmra.mxu0 %vm2706_vm9, %v5188_v27 }
 0x487   :  { %5193 = vmatmul.mubr.msk.f32.vlgmr.msra.gmra.mxu1 %vm2706_vm9, %v5192_v23  ;;  %4073 = vmatprep.subr.mxu0 %v3962_v0  ;;  %v4214_v16 = vpop.permute.xlu0 %4213  ;;  %v4470_v37 = vpop.permute.xlu1 %4469 }
 0x488   :  { %4144 = vmatprep.subr.mxu1 %v3970_v26  ;;  %4074 = vmatpush1.msra.mxu0 %v3964_v33 }
 0x489   :  { %4145 = vmatpush1.msra.mxu1 %v3960_v49  ;;  %4075 = vmatprep.subr.mxu0 %v6396_v8  ;;  %v4226_v8 = vsel %vm1703_vm6, %v4202_v54, %v6610_v30  ;;  %v6902_v30 = vld [vmem:[#allocation18_spill] sm:$0xff] }
 0x48a   :  { %4146 = vmatprep.subr.mxu1 %v6410_v6  ;;  %4076 = vmatpush1.msra.mxu0 %v6388_v52  ;;  %v4222_v52 = vsel %vm1703_vm6, %v4210_v58, %v4214_v16  ;;  %v4220_v6 = vsel %vm1703_vm6, %v4214_v16, %v4218_v31  ;;  %v6904_v31 = vld [vmem:[#allocation4_spill] sm:$0xff] }
 0x48b   :  { %4109 = vmatprep.mubr.f32.mxu0 %v6890_v43  ;;  %4147 = vmatpush1.msra.mxu1 %v6336_v59  ;;  %v4466_v36 = vpop.permute.xlu0 %4465  ;;  %v4458_v48 = vpop.permute.xlu1 %4457  ;;  %v5196_v59 = vld [vmem:[%s6819_s5 + $0x30] sm:$0xff]  ;;  %v4743_v3 = vsel %vm2245_vm8, %v6904_v31, %v6903_v2 }
 0x48c   :  { %4180 = vmatprep.mubr.f32.mxu1 %v6890_v43  ;;  %5194 = vmatmul.mubr.msk.f32.vlgmr.msra.gmra.mxu0 %vm2706_vm9, %v5192_v23  ;;  %v4488_v46 = vsel %vm1974_vm7, %v4458_v48, %v4462_v19  ;;  %v4484_v13 = vsel %vm1974_vm7, %v4466_v36, %v4470_v37 }
 0x48d   :  { %5195 = vmatmul.mubr.msk.f32.vlgmr.msra.gmra.mxu1 %vm2706_vm9, %v5192_v23  ;;  %4262 = vmatprep.subr.mxu0 %v4226_v8 }
 0x48e   :  { %4263 = vmatpush1.msra.mxu0 %v4228_v35  ;;  %4298 = vmatprep.mubr.f32.mxu0 %v6890_v43 }
 0x48f   :  { %4264 = vmatprep.subr.mxu0 %v6418_v14  ;;  %4333 = vmatprep.subr.mxu1 %v4222_v52  ;;  %v4474_v57 = vpop.permute.xlu0 %4473  ;;  %v4478_v60 = vpop.permute.xlu1 %4477  ;;  %v4486_v14 = vsel %vm1974_vm7, %v4462_v19, %v4466_v36 }
 0x490   :  { %4265 = vmatpush1.msra.mxu0 %v6891_v1  ;;  %4334 = vmatpush1.msra.mxu1 %v4224_v17  ;;  %v4482_v41 = vsel %vm1974_vm7, %v4470_v37, %v4474_v57  ;;  %v4490_v39 = vsel %vm1974_vm7, %v4478_v60, %v4458_v48  ;;  %v4480_v11 = vsel %vm1974_vm7, %v4474_v57, %v4478_v60 }
 0x491   :  { %5197 = vmatmul.mubr.msk.f32.vlgmr.msra.gmra.mxu0 %vm2706_vm9, %v5196_v59  ;;  %4404 = vmatprep.subr.mxu0 %v4230_v21 }
 0x492   :  { %4405 = vmatpush1.msra.mxu0 %v4220_v6  ;;  %4335 = vmatprep.subr.mxu1 %v6892_v4 }
 0x493   :  { %4406 = vmatprep.subr.mxu0 %v6893_v44  ;;  %4336 = vmatpush1.msra.mxu1 %v6894_v62  ;;  %v4722_v24 = vpop.permute.xlu0 %4721  ;;  %v4726_v50 = vpop.permute.xlu1 %4725 }
 0x494   :  { %4369 = vmatprep.mubr.f32.mxu1 %v6890_v43  ;;  %4407 = vmatpush1.msra.mxu0 %v6895_v51  ;;  %v4746_v34 = vsel %vm2245_vm8, %v4722_v24, %v4726_v50 }
 0x495   :  { %4440 = vmatprep.mubr.f32.mxu0 %v6890_v43  ;;  %5198 = vmatmul.mubr.msk.f32.vlgmr.msra.gmra.mxu1 %vm2706_vm9, %v5196_v59 }
 0x496   :  { %5199 = vmatmul.mubr.msk.f32.vlgmr.msra.gmra.mxu0 %vm2706_vm9, %v5196_v59  ;;  %4522 = vmatprep.subr.mxu1 %v4486_v14 }
 0x497   :  { %4523 = vmatpush1.msra.mxu1 %v4488_v46  ;;  %4558 = vmatprep.mubr.f32.mxu1 %v6890_v43  ;;  %v4718_v25 = vpop.permute.xlu0 %4717  ;;  %v4730_v55 = vpop.permute.xlu1 %4729 }
 0x498   :  { %4524 = vmatprep.subr.mxu1 %v6896_v15  ;;  %4593 = vmatprep.subr.mxu0 %v4482_v41  ;;  %v4744_v38 = vsel %vm2245_vm8, %v4726_v50, %v4730_v55 }
 0x499   :  { %4525 = vmatpush1.msra.mxu1 %v6463_v28  ;;  %4594 = vmatpush1.msra.mxu0 %v4484_v13  ;;  %v4748_v28 = vsel %vm2245_vm8, %v4718_v25, %v4722_v24 }
 0x49a   :  { %5201 = vmatmul.mubr.msk.f32.vlgmr.msra.gmra.mxu1 %vm2706_vm9, %v5200_v9  ;;  %4664 = vmatprep.subr.mxu1 %v4490_v39 }
 0x49b   :  { %4665 = vmatpush1.msra.mxu1 %v4480_v11  ;;  %4595 = vmatprep.subr.mxu0 %v6897_v7  ;;  %v4734_v56 = vpop.permute.xlu0 %4733  ;;  %v4738_v47 = vpop.permute.xlu1 %4737 }
 0x49c   :  { %4666 = vmatprep.subr.mxu1 %v6898_v42  ;;  %4596 = vmatpush1.msra.mxu0 %v6899_v10  ;;  %v4742_v22 = vsel %vm2245_vm8, %v4730_v55, %v4734_v56  ;;  %v4750_v5 = vsel %vm2245_vm8, %v4738_v47, %v4718_v25  ;;  %v4740_v20 = vsel %vm2245_vm8, %v4734_v56, %v4738_v47 }
 0x49d   :  { %4629 = vmatprep.mubr.f32.mxu0 %v6890_v43  ;;  %4667 = vmatpush1.msra.mxu1 %v6900_v53 }
 0x49e   :  { %4700 = vmatprep.mubr.f32.mxu1 %v6890_v43  ;;  %5202 = vmatmul.mubr.msk.f32.vlgmr.msra.gmra.mxu0 %vm2706_vm9, %v5200_v9 }
 0x49f   :  { %5203 = vmatmul.mubr.msk.f32.vlgmr.msra.gmra.mxu1 %vm2706_vm9, %v5200_v9  ;;  %4782 = vmatprep.subr.mxu0 %v4746_v34  ;;  %v4736_v45 = vpop.permute.xlu0 %4735  ;;  %v4732_v32 = vpop.permute.xlu1 %4731 }
 0x4a0   :  { %4783 = vmatpush1.msra.mxu0 %v4748_v28  ;;  %4818 = vmatprep.mubr.f32.mxu0 %v6890_v43  ;;  %v4741_v58 = vsel %vm2245_vm8, %v6903_v2, %v4732_v32  ;;  %v4749_v27 = vsel %vm2245_vm8, %v4736_v45, %v6901_v40  ;;  %v4739_v54 = vsel %vm2245_vm8, %v4732_v32, %v4736_v45 }
 0x4a1   :  { %4784 = vmatprep.subr.mxu0 %v6902_v30  ;;  %4853 = vmatprep.subr.mxu1 %v4742_v22 }
 0x4a2   :  { %4785 = vmatpush1.msra.mxu0 %v4747_v63  ;;  %4854 = vmatpush1.msra.mxu1 %v4744_v38 }
 0x4a3   :  { %5205 = vmatmul.mubr.msk.f32.vlgmr.msra.gmra.mxu0 %vm2706_vm9, %v5204_v12  ;;  %4924 = vmatprep.subr.mxu0 %v4750_v5 }
 0x4a4   :  { %4925 = vmatpush1.msra.mxu0 %v4740_v20  ;;  %4855 = vmatprep.subr.mxu1 %v4741_v58 }
 0x4a5   :  { %4926 = vmatprep.subr.mxu0 %v4749_v27  ;;  %4856 = vmatpush1.msra.mxu1 %v4743_v3 }
 0x4a6   :  { %4889 = vmatprep.mubr.f32.mxu1 %v6890_v43  ;;  %4927 = vmatpush1.msra.mxu0 %v4739_v54 }
 0x4a7   :  { %4960 = vmatprep.mubr.f32.mxu0 %v6890_v43  ;;  %5206 = vmatmul.mubr.msk.f32.vlgmr.msra.gmra.mxu1 %vm2706_vm9, %v5204_v12 }
 0x4a8   :  { %5207 = vmatmul.mubr.msk.f32.vlgmr.msra.gmra.mxu0 %vm2706_vm9, %v5204_v12 }
 0x4ac   :  { %v2667_v55 = vpop.permute.xlu1 %2666 }
 0x519   :  { %v2776_v61 = vpop.f32.mrf.mxu1 }
 0x51a   :  { %v2923_v15 = vadd.f32 %v2776_v61, %v2667_v55 }
 0x51b   :  { %v2778_v18 = vpop.f32.mrf.mxu1 }
 0x51c   :  { %v2924_v56 = vadd.f32 %v2778_v18, %v2667_v55 }
 0x51d   :  { %v2918_v23 = vpop.f32.mrf.mxu0 }
 0x51e   :  { %v2847_v19 = vpop.f32.mrf.mxu1  ;;  %v2927_v22 = vadd.f32 %v2918_v23, %v2667_v55 }
 0x51f   :  { %v2920_v33 = vpop.f32.mrf.mxu0  ;;  %v2925_v10 = vadd.f32 %v2847_v19, %v2667_v55 }
 0x520   :  { %v2849_v0 = vpop.f32.mrf.mxu1  ;;  %v2928_v5 = vadd.f32 %v2920_v33, %v2667_v55 }
 0x521   :  { %v2926_v45 = vadd.f32 %v2849_v0, %v2667_v55 }
 0x522   :  { %v3036_v29 = vpop.f32.mrf.mxu1 }
 0x523   :  { %v3183_v47 = vadd.f32 %v3036_v29, %v2923_v15 }
 0x524   :  { %v3038_v16 = vpop.f32.mrf.mxu1 }
 0x525   :  { %v3184_v34 = vadd.f32 %v3038_v16, %v2924_v56 }
 0x526   :  { %v3107_v26 = vpop.f32.mrf.mxu0 }
 0x527   :  { %v3178_v49 = vpop.f32.mrf.mxu1  ;;  %v3185_v32 = vadd.f32 %v3107_v26, %v2925_v10 }
 0x528   :  { %v3109_v37 = vpop.f32.mrf.mxu0  ;;  %v3187_v38 = vadd.f32 %v3178_v49, %v2927_v22 }
 0x529   :  { %v3180_v36 = vpop.f32.mrf.mxu1  ;;  %v3186_v30 = vadd.f32 %v3109_v37, %v2926_v45 }
 0x52a   :  { %v3188_v54 = vadd.f32 %v3180_v36, %v2928_v5 }
 0x52c   :  { %v3296_v35 = vpop.f32.mrf.mxu0 }
 0x52d   :  { %v3443_v53 = vadd.f32 %v3296_v35, %v3183_v47 }
 0x52e   :  { %v3298_v48 = vpop.f32.mrf.mxu0 }
 0x52f   :  { %v3444_v40 = vadd.f32 %v3298_v48, %v3184_v34 }
 0x531   :  { %v3367_v8 = vpop.f32.mrf.mxu1  ;;  %v3438_v52 = vpop.f32.mrf.mxu0 }
 0x532   :  { %v3445_v20 = vadd.f32 %v3367_v8, %v3185_v32  ;;  %v3447_v31 = vadd.f32 %v3438_v52, %v3187_v38 }
 0x533   :  { %v3369_v43 = vpop.f32.mrf.mxu1  ;;  %v3440_v17 = vpop.f32.mrf.mxu0 }
 0x534   :  { %v3446_v61 = vadd.f32 %v3369_v43, %v3186_v30  ;;  %v3448_v0 = vadd.f32 %v3440_v17, %v3188_v54 }
 0x536   :  { %v3556_v59 = vpop.f32.mrf.mxu1 }
 0x537   :  { %v3703_v63 = vadd.f32 %v3556_v59, %v3443_v53 }
 0x538   :  { %v3558_v6 = vpop.f32.mrf.mxu1 }
 0x539   :  { %v3704_v2 = vadd.f32 %v3558_v6, %v3444_v40 }
 0x53a   :  { %v3627_v57 = vpop.f32.mrf.mxu0 }
 0x53b   :  { %v3698_v60 = vpop.f32.mrf.mxu1  ;;  %v3705_v18 = vadd.f32 %v3627_v57, %v3445_v20 }
 0x53c   :  { %v3629_v1 = vpop.f32.mrf.mxu0  ;;  %v3707_v26 = vadd.f32 %v3698_v60, %v3447_v31 }
 0x53d   :  { %v3700_v21 = vpop.f32.mrf.mxu1  ;;  %v3706_v16 = vadd.f32 %v3629_v1, %v3446_v61 }
 0x53e   :  { %v3708_v49 = vadd.f32 %v3700_v21, %v3448_v0 }
 0x540   :  { %v3780_v4 = vpop.f32.mrf.mxu0 }
 0x541   :  { %v3851_v44 = vpop.f32.mrf.mxu1  ;;  %v3927_v58 = vadd.f32 %v3780_v4, %v3703_v63 }
 0x542   :  { %v3782_v62 = vpop.f32.mrf.mxu0  ;;  %v3929_v35 = vadd.f32 %v3851_v44, %v3705_v18 }
 0x543   :  { %v3853_v14 = vpop.f32.mrf.mxu1  ;;  %v3928_v19 = vadd.f32 %v3782_v62, %v3704_v2 }
 0x544   :  { %v3930_v6 = vadd.f32 %v3853_v14, %v3706_v16 }
 0x546   :  { %v3922_v24 = vpop.f32.mrf.mxu0 }
 0x547   :  { %v4040_v50 = vpop.f32.mrf.mxu1  ;;  %v3931_v37 = vadd.f32 %v3922_v24, %v3707_v26 }
 0x548   :  { %v3924_v46 = vpop.f32.mrf.mxu0  ;;  %v4187_v29 = vadd.f32 %v4040_v50, %v3927_v58 }
 0x549   :  { %v4042_v51 = vpop.f32.mrf.mxu1  ;;  %v3932_v55 = vadd.f32 %v3924_v46, %v3708_v49 }
 0x54a   :  { %v4188_v48 = vadd.f32 %v4042_v51, %v3928_v19 }
 0x54c   :  { %v4111_v41 = vpop.f32.mrf.mxu0 }
 0x54d   :  { %v4182_v39 = vpop.f32.mrf.mxu1  ;;  %v4189_v4 = vadd.f32 %v4111_v41, %v3929_v35 }
 0x54e   :  { %v4113_v9 = vpop.f32.mrf.mxu0  ;;  %v4191_v43 = vadd.f32 %v4182_v39, %v3931_v37 }
 0x54f   :  { %v4184_v13 = vpop.f32.mrf.mxu1  ;;  %v4190_v62 = vadd.f32 %v4113_v9, %v3930_v6 }
 0x550   :  { %v4192_v60 = vadd.f32 %v4184_v13, %v3932_v55 }
 0x551   :  { %v4300_v25 = vpop.f32.mrf.mxu0 }
 0x552   :  { %v4447_v33 = vadd.f32 %v4300_v25, %v4187_v29 }
 0x553   :  { %v4302_v11 = vpop.f32.mrf.mxu0 }
 0x554   :  { %v4448_v36 = vadd.f32 %v4302_v11, %v4188_v48 }
 0x555   :  { %v4371_v7 = vpop.f32.mrf.mxu1 }
 0x556   :  { %v4442_v28 = vpop.f32.mrf.mxu0  ;;  %v4449_v50 = vadd.f32 %v4371_v7, %v4189_v4 }
 0x557   :  { %v4373_v42 = vpop.f32.mrf.mxu1  ;;  %v4451_v1 = vadd.f32 %v4442_v28, %v4191_v43 }
 0x558   :  { %v4444_v27 = vpop.f32.mrf.mxu0  ;;  %v4450_v25 = vadd.f32 %v4373_v42, %v4190_v62 }
 0x559   :  { %v4452_v47 = vadd.f32 %v4444_v27, %v4192_v60 }
 0x55a   :  { %v4560_v12 = vpop.f32.mrf.mxu1 }
 0x55b   :  { %v4707_v52 = vadd.f32 %v4560_v12, %v4447_v33 }
 0x55c   :  { %v4562_v3 = vpop.f32.mrf.mxu1 }
 0x55d   :  { %v4708_v15 = vadd.f32 %v4562_v3, %v4448_v36 }
 0x55e   :  { %v4631_v23 = vpop.f32.mrf.mxu0 }
 0x55f   :  { %v4702_v8 = vpop.f32.mrf.mxu1  ;;  %v4709_v21 = vadd.f32 %v4631_v23, %v4449_v50 }
 0x560   :  { %v4633_v59 = vpop.f32.mrf.mxu0  ;;  %v4711_v14 = vadd.f32 %v4702_v8, %v4451_v1 }
 0x561   :  { %v4704_v44 = vpop.f32.mrf.mxu1  ;;  %v4710_v11 = vadd.f32 %v4633_v59, %v4450_v25 }
 0x562   :  { %v4712_v9 = vadd.f32 %v4704_v44, %v4452_v47 }
 0x563   :  { %v4820_v57 = vpop.f32.mrf.mxu0 }
 0x564   :  { %v4967_v17 = vadd.f32 %v4820_v57, %v4707_v52 }
 0x565   :  { %v4822_v51 = vpop.f32.mrf.mxu0 }
 0x566   :  { %v4973_v24 = vrot.slane %v4967_v17, 4  ;;  %v4968_v56 = vadd.f32 %v4822_v51, %v4708_v15 }
 0x567   :  { %v4891_v41 = vpop.f32.mrf.mxu1 }
 0x568   :  { %v4974_v10 = vmax.f32 %v4967_v17, %v4973_v24  ;;  %v4979_v46 = vrot.slane %v4968_v56, 4  ;;  %v4969_v39 = vadd.f32 %v4891_v41, %v4709_v21  ;;  %v4962_v34 = vpop.f32.mrf.mxu0 }
 0x569   :  { %v4971_v7 = vadd.f32 %v4962_v34, %v4711_v14  ;;  %v4893_v53 = vpop.f32.mrf.mxu1 }
 0x56a   :  { %v4975_v22 = vrot.slane %v4974_v10, 2  ;;  %v4980_v13 = vmax.f32 %v4968_v56, %v4979_v46  ;;  %v4985_v28 = vrot.slane %v4969_v39, 4  ;;  %v4970_v45 = vadd.f32 %v4893_v53, %v4710_v11  ;;  %v4964_v32 = vpop.f32.mrf.mxu0 }
 0x56b   :  { %v4997_v42 = vrot.slane %v4971_v7, 4  ;;  %v4972_v40 = vadd.f32 %v4964_v32, %v4712_v9 }
 0x56c   :  { %v4976_v63 = vmax.f32 %v4974_v10, %v4975_v22  ;;  %v4981_v12 = vrot.slane %v4980_v13, 2  ;;  %v4986_v5 = vmax.f32 %v4969_v39, %v4985_v28  ;;  %v4991_v38 = vrot.slane %v4970_v45, 4 }
 0x56d   :  { %v4998_v30 = vmax.f32 %v4971_v7, %v4997_v42  ;;  %v5003_v20 = vrot.slane %v4972_v40, 4 }
 0x56e   :  { %v4977_v2 = vrot.slane %v4976_v63, 1  ;;  %v4982_v58 = vmax.f32 %v4980_v13, %v4981_v12  ;;  %v4987_v27 = vrot.slane %v4986_v5, 2  ;;  %v4992_v54 = vmax.f32 %v4970_v45, %v4991_v38 }
 0x56f   :  { %v4999_v31 = vrot.slane %v4998_v30, 2  ;;  %v5004_v3 = vmax.f32 %v4972_v40, %v5003_v20 }
 0x570   :  { %v4978_v61 = vmax.f32 %v4976_v63, %v4977_v2  ;;  %v4983_v18 = vrot.slane %v4982_v58, 1  ;;  %v4988_v19 = vmax.f32 %v4986_v5, %v4987_v27  ;;  %v4993_v29 = vrot.slane %v4992_v54, 2 }
 0x571   :  { %v5000_v23 = vmax.f32 %v4998_v30, %v4999_v31  ;;  %v5005_v0 = vrot.slane %v5004_v3, 2 }
 0x572   :  { %v5009_v26 = vsub.f32 %v4967_v17, %v4978_v61  ;;  %v4984_v16 = vmax.f32 %v4982_v58, %v4983_v18  ;;  %v4989_v35 = vrot.slane %v4988_v19, 1  ;;  %v4994_v48 = vmax.f32 %v4992_v54, %v4993_v29 }
 0x573   :  { %v5001_v33 = vrot.slane %v5000_v23, 1  ;;  %v5006_v49 = vmax.f32 %v5004_v3, %v5005_v0 }
 0x574   :  { %v5015_v37 = vmul.f32 1.442695, %v5009_v26  ;;  %v5010_v8 = vsub.f32 %v4968_v56, %v4984_v16  ;;  %v4990_v59 = vmax.f32 %v4988_v19, %v4989_v35  ;;  %v4995_v6 = vrot.slane %v4994_v48, 1 }
 0x575   :  { %v5002_v4 = vmax.f32 %v5000_v23, %v5001_v33  ;;  %v5007_v36 = vrot.slane %v5006_v49, 1 }
 0x576   :  { %5224 = vpow2.f32 %v5015_v37  ;;  %v5017_v52 = vmul.f32 1.442695, %v5010_v8  ;;  %v5011_v55 = vsub.f32 %v4969_v39, %v4990_v59  ;;  %v4996_v43 = vmax.f32 %v4994_v48, %v4995_v6 }
 0x577   :  { %v5013_v57 = vsub.f32 %v4971_v7, %v5002_v4  ;;  %v5008_v62 = vmax.f32 %v5006_v49, %v5007_v36 }
 0x578   :  { %5226 = vpow2.f32 %v5017_v52  ;;  %v5019_v50 = vmul.f32 1.442695, %v5011_v55  ;;  %v5012_v15 = vsub.f32 %v4970_v45, %v4996_v43 }
 0x579   :  { %v5023_v17 = vmul.f32 1.442695, %v5013_v57  ;;  %v5014_v60 = vsub.f32 %v4972_v40, %v5008_v62 }
 0x57a   :  { %5228 = vpow2.f32 %v5019_v50  ;;  %v5021_v1 = vmul.f32 1.442695, %v5012_v15 }
 0x57b   :  { %5230 = vpow2.f32 %v5023_v17  ;;  %v5025_v44 = vmul.f32 1.442695, %v5014_v60 }
 0x57c   :  { %5232 = vpow2.f32 %v5021_v1 }
 0x57d   :  { %5234 = vpow2.f32 %v5025_v44 }
 0x583   :  { %v5225_v51 = vpop.eup %5224 }
 0x584   :  { %v5027_v25 = vrot.slane %v5225_v51, 4 }
 0x585   :  { %v6769_v21 = vpop.eup %5226 }
 0x586   :  { %v5028_v24 = vadd.f32 %v5225_v51, %v5027_v25  ;;  %v5033_v56 = vrot.slane %v6769_v21, 4 }
 0x587   :  { %v6772_v47 = vpop.eup %5228 }
 0x588   :  { %v6774_v14 = vpop.eup %5230  ;;  %v5029_v41 = vrot.slane %v5028_v24, 2  ;;  %v5034_v11 = vadd.f32 %v6769_v21, %v5033_v56  ;;  %v5039_v10 = vrot.slane %v6772_v47, 4 }
 0x589   :  { %v6778_v46 = vpop.eup %5232  ;;  %v5051_v39 = vrot.slane %v6774_v14, 4 }
 0x58a   :  { %v6781_v34 = vpop.eup %5234  ;;  %v5030_v9 = vadd.f32 %v5029_v41, %v5028_v24  ;;  %v5035_v7 = vrot.slane %v5034_v11, 2  ;;  %v5040_v53 = vadd.f32 %v6772_v47, %v5039_v10  ;;  %v5045_v22 = vrot.slane %v6778_v46, 4 }
 0x58b   :  { %v5052_v13 = vadd.f32 %v6774_v14, %v5051_v39  ;;  %v5057_v28 = vrot.slane %v6781_v34, 4 }
 0x58c   :  { %v5031_v45 = vrot.slane %v5030_v9, 1  ;;  %v5036_v32 = vadd.f32 %v5035_v7, %v5034_v11  ;;  %v5041_v42 = vrot.slane %v5040_v53, 2  ;;  %v5046_v40 = vadd.f32 %v6778_v46, %v5045_v22 }
 0x58d   :  { %v5053_v63 = vrot.slane %v5052_v13, 2  ;;  %v5058_v12 = vadd.f32 %v6781_v34, %v5057_v28 }
 0x58e   :  { %v5032_v5 = vadd.f32 %v5031_v45, %v5030_v9  ;;  %v5037_v38 = vrot.slane %v5036_v32, 1  ;;  %v5042_v30 = vadd.f32 %v5041_v42, %v5040_v53  ;;  %v5047_v20 = vrot.slane %v5046_v40, 2 }
 0x58f   :  { %v5054_v2 = vadd.f32 %v5053_v63, %v5052_v13  ;;  %v5059_v58 = vrot.slane %v5058_v12, 2 }
 0x590   :  { %5236 = vrcp.f32 %v5032_v5  ;;  %v5038_v27 = vadd.f32 %v5037_v38, %v5036_v32  ;;  %v5043_v54 = vrot.slane %v5042_v30, 1  ;;  %v5048_v31 = vadd.f32 %v5047_v20, %v5046_v40 }
 0x591   :  { %v5055_v3 = vrot.slane %v5054_v2, 1  ;;  %v5060_v61 = vadd.f32 %v5059_v58, %v5058_v12 }
 0x592   :  { %5238 = vrcp.f32 %v5038_v27  ;;  %v5044_v18 = vadd.f32 %v5043_v54, %v5042_v30  ;;  %v5049_v19 = vrot.slane %v5048_v31, 1 }
 0x593   :  { %v5056_v29 = vadd.f32 %v5055_v3, %v5054_v2  ;;  %v5061_v23 = vrot.slane %v5060_v61, 1 }
 0x594   :  { %5240 = vrcp.f32 %v5044_v18  ;;  %v5050_v0 = vadd.f32 %v5049_v19, %v5048_v31 }
 0x595   :  { %5242 = vrcp.f32 %v5056_v29  ;;  %v5062_v26 = vadd.f32 %v5061_v23, %v5060_v61 }
 0x596   :  { %5244 = vrcp.f32 %v5050_v0 }
 0x597   :  { %5246 = vrcp.f32 %v5062_v26 }
 0x59d   :  { %v5237_v16 = vpop.eup %5236 }
 0x59e   :  { %v5069_v35 = vmul.f32 %v5237_v16, %v5032_v5 }
 0x59f   :  { %v5239_v48 = vpop.eup %5238 }
 0x5a0   :  { %v5075_v33 = vsub.f32 2.0, %v5069_v35  ;;  %v5070_v49 = vmul.f32 %v5239_v48, %v5038_v27 }
 0x5a1   :  { %v5241_v37 = vpop.eup %5240 }
 0x5a2   :  { %v5243_v8 = vpop.eup %5242  ;;  %v5081_v59 = vmul.f32 %v5237_v16, %v5075_v33  ;;  %v5076_v6 = vsub.f32 2.0, %v5070_v49  ;;  %v5071_v4 = vmul.f32 %v5241_v37, %v5044_v18 }
 0x5a3   :  { %v5245_v36 = vpop.eup %5244  ;;  %v5073_v52 = vmul.f32 %v5243_v8, %v5056_v29 }
 0x5a4   :  { %v5247_v55 = vpop.eup %5246  ;;  %v5087_v43 = vmul.f32 %v5225_v51, %v5081_v59  ;;  %v5082_v57 = vmul.f32 %v5239_v48, %v5076_v6  ;;  %v5077_v62 = vsub.f32 2.0, %v5071_v4  ;;  %v5072_v50 = vmul.f32 %v5245_v36, %v5050_v0 }
 0x5a5   :  { %v5079_v15 = vsub.f32 2.0, %v5073_v52  ;;  %v5074_v17 = vmul.f32 %v5247_v55, %v5062_v26 }
 0x5a6   :  { %5093 = vst [vmem:[%s6820_s8] sm:$0xff] %v5087_v43  ;;  %v5088_v60 = vmul.f32 %v6769_v21, %v5082_v57  ;;  %v5083_v1 = vmul.f32 %v5241_v37, %v5077_v62  ;;  %v5078_v44 = vsub.f32 2.0, %v5072_v50 }
 0x5a7   :  { %v5085_v25 = vmul.f32 %v5243_v8, %v5079_v15  ;;  %v5080_v24 = vsub.f32 2.0, %v5074_v17 }
 0x5a8   :  { %5094 = vst [vmem:[%s6820_s8 + $0x8] sm:$0xff] %v5088_v60  ;;  %v5089_v51 = vmul.f32 %v6772_v47, %v5083_v1  ;;  %v5084_v56 = vmul.f32 %v5245_v36, %v5078_v44 }
 0x5a9   :  { %v5091_v41 = vmul.f32 %v6774_v14, %v5085_v25  ;;  %v5086_v11 = vmul.f32 %v5247_v55, %v5080_v24 }
 0x5aa   :  { %5095 = vst [vmem:[%s6820_s8 + $0x10] sm:$0xff] %v5089_v51  ;;  %v5090_v21 = vmul.f32 %v6778_v46, %v5084_v56 }
 0x5ab   :  { %5097 = vst [vmem:[%s6820_s8 + $0x20] sm:$0xff] %v5091_v41  ;;  %v5092_v10 = vmul.f32 %v6781_v34, %v5086_v11 }
 0x5ac   :  { %5096 = vst [vmem:[%s6820_s8 + $0x18] sm:$0xff] %v5090_v21 }
 0x5ad   :  { %5098 = vst [vmem:[%s6820_s8 + $0x28] sm:$0xff] %v5092_v10 }

</bundles_post_ra>
